<compile_context>
chip_gen: v5e
topology: v5e:2x2
jax: 0.10.0
libtpu: 0.0.40
codegen_flags: <defaults>
</compile_context>

<pallas_src>
import jax
import jax.numpy as jnp
import numpy as np
from jax.experimental import pallas as pl
from jax.experimental.pallas import tpu as pltpu

_K = 7      # kernel_size (PyTorch default)
_PAD = 3    # padding for kernel_size == 7


def spatial_attention_kernel(x_ref, w_ref, o_ref):
    """One batch image per grid step.

    x_ref : (1, C, H+6, W+6) VMEM block -- zero-padded NCHW input.
    w_ref : (2*7*7,) f32 in SMEM -- flattened conv weight, avg taps first
            (matches torch.cat([avg, max], dim=1) channel order).
    o_ref : (1, H, W) VMEM -- sigmoid(conv2d(cat([avg, max]))) output.
    """
    c = x_ref.shape[1]
    h = o_ref.shape[1]
    w = o_ref.shape[2]

    xb = x_ref[0]                                   # (C, Hp, Wp)

    # Channel mean / max (unrolled over tiny C, pure VPU work).
    avg = xb[0]
    mx = xb[0]
    for ci in range(1, c):
        ch = xb[ci]
        avg = avg + ch
        mx = jnp.maximum(mx, ch)
    avg = avg * (1.0 / c)

    # 7x7 cross-correlation as 49 shifted taps per map; scalar weights from
    # SMEM broadcast against the (H, W) tiles.
    acc = jnp.zeros((h, w), jnp.float32)
    for dh in range(_K):
        for dw in range(_K):
            t = dh * _K + dw
            acc = (acc
                   + avg[dh:dh + h, dw:dw + w] * w_ref[t]
                   + mx[dh:dh + h, dw:dw + w] * w_ref[_K * _K + t])

    o_ref[0] = jax.nn.sigmoid(acc)


def spatial_attention_pallas(x, conv_w):
    """x: (N, C, H, W) float32; conv_w: (1, 2, 7, 7) float32 -> (N, 1, H, W)."""
    n, c, h, w = x.shape
    hp, wp = h + 2 * _PAD, w + 2 * _PAD

    # Zero-pad spatially once in the wrapper (glue). avg/max of an all-zero
    # column is 0, identical to PyTorch's zero padding of the [avg, max] map.
    x_pad = jnp.pad(x.astype(jnp.float32),
                    ((0, 0), (0, 0), (_PAD, _PAD), (_PAD, _PAD)))
    w_flat = conv_w.reshape(-1).astype(jnp.float32)     # (98,), avg taps first

    out = pl.pallas_call(
        spatial_attention_kernel,
        out_shape=jax.ShapeDtypeStruct((n, h, w), jnp.float32),
        grid_spec=pltpu.PrefetchScalarGridSpec(
            num_scalar_prefetch=0,
            grid=(n,),
            in_specs=[
                pl.BlockSpec((1, c, hp, wp), lambda i: (i, 0, 0, 0)),
                pl.BlockSpec(memory_space=pltpu.MemorySpace.SMEM),
            ],
            out_specs=pl.BlockSpec((1, h, w), lambda i: (i, 0, 0)),
        ),
        compiler_params=pltpu.CompilerParams(
            dimension_semantics=("parallel",)),
    )(x_pad, w_flat)

    return out[:, None, :, :]


def spatial_attention_reference(x, conv_w):
    """Pure-JAX reference mirroring the PyTorch forward."""
    avg = jnp.mean(x, axis=1, keepdims=True)
    mx = jnp.max(x, axis=1, keepdims=True)
    cat = jnp.concatenate([avg, mx], axis=1)            # (N, 2, H, W)
    y = jax.lax.conv_general_dilated(
        cat, conv_w, window_strides=(1, 1),
        padding=((_PAD, _PAD), (_PAD, _PAD)),
        dimension_numbers=("NCHW", "OIHW", "NCHW"))
    return jax.nn.sigmoid(y)


if __name__ == "__main__":
    N, C, H, W = 2, 4, 16, 16
    key = jax.random.PRNGKey(0)
    kx, kw = jax.random.split(key)

    x = jax.random.normal(kx, (N, C, H, W), jnp.float32)
    conv_w = jax.random.normal(kw, (1, 2, _K, _K), jnp.float32) * 0.3

    out = jax.block_until_ready(spatial_attention_pallas(x, conv_w))
    ref = jax.block_until_ready(spatial_attention_reference(x, conv_w))

    np.testing.assert_allclose(np.asarray(out), np.asarray(ref),
                               rtol=1e-5, atol=1e-5)
    print("KERNEL_OK")
</pallas_src>

<mosaic_0001>
module attributes {stable_mosaic.version = 11 : i64} {
  func.func @spatial_attention_kernel(%arg0: i32, %arg1: memref<1x4x22x22xf32, #tpu.memory_space<vmem>>, %arg2: memref<98xf32, #tpu.memory_space<smem>>, %arg3: memref<1x16x16xf32, #tpu.memory_space<vmem>>) attributes {dimension_semantics = [#tpu.dimension_semantics<parallel>], iteration_bounds = array<i64: 2>, scalar_prefetch = 0 : i64, scratch_operands = 0 : i64, tpu.core_type = #tpu.core_type<tc>, window_params = [{transform_indices = @transform_0, window_bounds = array<i64: 1, 4, 22, 22>}, {transform_indices = @transform_1, window_bounds = array<i64: 98>}, {transform_indices = @transform_2, window_bounds = array<i64: 1, 16, 16>}]} {
    %c0 = arith.constant 0 : index
    %c0_0 = arith.constant 0 : index
    %c0_1 = arith.constant 0 : index
    %c0_2 = arith.constant 0 : index
    %0 = vector.load %arg1[%c0, %c0_0, %c0_1, %c0_2] : memref<1x4x22x22xf32, #tpu.memory_space<vmem>>, vector<1x4x22x22xf32>
    %1 = vector.shape_cast %0 : vector<1x4x22x22xf32> to vector<4x22x22xf32>
    %2 = vector.extract_strided_slice %1 {offsets = [0, 0, 0], sizes = [1, 22, 22], strides = [1, 1, 1]} : vector<4x22x22xf32> to vector<1x22x22xf32>
    %3 = vector.shape_cast %2 : vector<1x22x22xf32> to vector<22x22xf32>
    %4 = vector.extract_strided_slice %1 {offsets = [0, 0, 0], sizes = [1, 22, 22], strides = [1, 1, 1]} : vector<4x22x22xf32> to vector<1x22x22xf32>
    %5 = vector.shape_cast %4 : vector<1x22x22xf32> to vector<22x22xf32>
    %6 = vector.extract_strided_slice %1 {offsets = [1, 0, 0], sizes = [1, 22, 22], strides = [1, 1, 1]} : vector<4x22x22xf32> to vector<1x22x22xf32>
    %7 = vector.shape_cast %6 : vector<1x22x22xf32> to vector<22x22xf32>
    %8 = arith.addf %3, %7 : vector<22x22xf32>
    %9 = arith.maximumf %5, %7 : vector<22x22xf32>
    %10 = vector.extract_strided_slice %1 {offsets = [2, 0, 0], sizes = [1, 22, 22], strides = [1, 1, 1]} : vector<4x22x22xf32> to vector<1x22x22xf32>
    %11 = vector.shape_cast %10 : vector<1x22x22xf32> to vector<22x22xf32>
    %12 = arith.addf %8, %11 : vector<22x22xf32>
    %13 = arith.maximumf %9, %11 : vector<22x22xf32>
    %14 = vector.extract_strided_slice %1 {offsets = [3, 0, 0], sizes = [1, 22, 22], strides = [1, 1, 1]} : vector<4x22x22xf32> to vector<1x22x22xf32>
    %15 = vector.shape_cast %14 : vector<1x22x22xf32> to vector<22x22xf32>
    %16 = arith.addf %12, %15 : vector<22x22xf32>
    %17 = arith.maximumf %13, %15 : vector<22x22xf32>
    %cst = arith.constant 2.500000e-01 : f32
    %18 = vector.broadcast %cst : f32 to vector<22x22xf32>
    %19 = arith.mulf %16, %18 : vector<22x22xf32>
    %cst_3 = arith.constant 0.000000e+00 : f32
    %20 = vector.broadcast %cst_3 : f32 to vector<16x16xf32>
    %21 = vector.extract_strided_slice %19 {offsets = [0, 0], sizes = [16, 16], strides = [1, 1]} : vector<22x22xf32> to vector<16x16xf32>
    %c0_4 = arith.constant 0 : index
    %22 = memref.load %arg2[%c0_4] : memref<98xf32, #tpu.memory_space<smem>>
    %23 = vector.broadcast %22 : f32 to vector<16x16xf32>
    %24 = arith.mulf %21, %23 : vector<16x16xf32>
    %25 = arith.addf %20, %24 : vector<16x16xf32>
    %26 = vector.extract_strided_slice %17 {offsets = [0, 0], sizes = [16, 16], strides = [1, 1]} : vector<22x22xf32> to vector<16x16xf32>
    %c49 = arith.constant 49 : index
    %27 = memref.load %arg2[%c49] : memref<98xf32, #tpu.memory_space<smem>>
    %28 = vector.broadcast %27 : f32 to vector<16x16xf32>
    %29 = arith.mulf %26, %28 : vector<16x16xf32>
    %30 = arith.addf %25, %29 : vector<16x16xf32>
    %31 = vector.extract_strided_slice %19 {offsets = [0, 1], sizes = [16, 16], strides = [1, 1]} : vector<22x22xf32> to vector<16x16xf32>
    %c1 = arith.constant 1 : index
    %32 = memref.load %arg2[%c1] : memref<98xf32, #tpu.memory_space<smem>>
    %33 = vector.broadcast %32 : f32 to vector<16x16xf32>
    %34 = arith.mulf %31, %33 : vector<16x16xf32>
    %35 = arith.addf %30, %34 : vector<16x16xf32>
    %36 = vector.extract_strided_slice %17 {offsets = [0, 1], sizes = [16, 16], strides = [1, 1]} : vector<22x22xf32> to vector<16x16xf32>
    %c50 = arith.constant 50 : index
    %37 = memref.load %arg2[%c50] : memref<98xf32, #tpu.memory_space<smem>>
    %38 = vector.broadcast %37 : f32 to vector<16x16xf32>
    %39 = arith.mulf %36, %38 : vector<16x16xf32>
    %40 = arith.addf %35, %39 : vector<16x16xf32>
    %41 = vector.extract_strided_slice %19 {offsets = [0, 2], sizes = [16, 16], strides = [1, 1]} : vector<22x22xf32> to vector<16x16xf32>
    %c2 = arith.constant 2 : index
    %42 = memref.load %arg2[%c2] : memref<98xf32, #tpu.memory_space<smem>>
    %43 = vector.broadcast %42 : f32 to vector<16x16xf32>
    %44 = arith.mulf %41, %43 : vector<16x16xf32>
    %45 = arith.addf %40, %44 : vector<16x16xf32>
    %46 = vector.extract_strided_slice %17 {offsets = [0, 2], sizes = [16, 16], strides = [1, 1]} : vector<22x22xf32> to vector<16x16xf32>
    %c51 = arith.constant 51 : index
    %47 = memref.load %arg2[%c51] : memref<98xf32, #tpu.memory_space<smem>>
    %48 = vector.broadcast %47 : f32 to vector<16x16xf32>
    %49 = arith.mulf %46, %48 : vector<16x16xf32>
    %50 = arith.addf %45, %49 : vector<16x16xf32>
    %51 = vector.extract_strided_slice %19 {offsets = [0, 3], sizes = [16, 16], strides = [1, 1]} : vector<22x22xf32> to vector<16x16xf32>
    %c3 = arith.constant 3 : index
    %52 = memref.load %arg2[%c3] : memref<98xf32, #tpu.memory_space<smem>>
    %53 = vector.broadcast %52 : f32 to vector<16x16xf32>
    %54 = arith.mulf %51, %53 : vector<16x16xf32>
    %55 = arith.addf %50, %54 : vector<16x16xf32>
    %56 = vector.extract_strided_slice %17 {offsets = [0, 3], sizes = [16, 16], strides = [1, 1]} : vector<22x22xf32> to vector<16x16xf32>
    %c52 = arith.constant 52 : index
    %57 = memref.load %arg2[%c52] : memref<98xf32, #tpu.memory_space<smem>>
    %58 = vector.broadcast %57 : f32 to vector<16x16xf32>
    %59 = arith.mulf %56, %58 : vector<16x16xf32>
    %60 = arith.addf %55, %59 : vector<16x16xf32>
    %61 = vector.extract_strided_slice %19 {offsets = [0, 4], sizes = [16, 16], strides = [1, 1]} : vector<22x22xf32> to vector<16x16xf32>
    %c4 = arith.constant 4 : index
    %62 = memref.load %arg2[%c4] : memref<98xf32, #tpu.memory_space<smem>>
    %63 = vector.broadcast %62 : f32 to vector<16x16xf32>
    %64 = arith.mulf %61, %63 : vector<16x16xf32>
    %65 = arith.addf %60, %64 : vector<16x16xf32>
    %66 = vector.extract_strided_slice %17 {offsets = [0, 4], sizes = [16, 16], strides = [1, 1]} : vector<22x22xf32> to vector<16x16xf32>
    %c53 = arith.constant 53 : index
    %67 = memref.load %arg2[%c53] : memref<98xf32, #tpu.memory_space<smem>>
    %68 = vector.broadcast %67 : f32 to vector<16x16xf32>
    %69 = arith.mulf %66, %68 : vector<16x16xf32>
    %70 = arith.addf %65, %69 : vector<16x16xf32>
    %71 = vector.extract_strided_slice %19 {offsets = [0, 5], sizes = [16, 16], strides = [1, 1]} : vector<22x22xf32> to vector<16x16xf32>
    %c5 = arith.constant 5 : index
    %72 = memref.load %arg2[%c5] : memref<98xf32, #tpu.memory_space<smem>>
    %73 = vector.broadcast %72 : f32 to vector<16x16xf32>
    %74 = arith.mulf %71, %73 : vector<16x16xf32>
    %75 = arith.addf %70, %74 : vector<16x16xf32>
    %76 = vector.extract_strided_slice %17 {offsets = [0, 5], sizes = [16, 16], strides = [1, 1]} : vector<22x22xf32> to vector<16x16xf32>
    %c54 = arith.constant 54 : index
    %77 = memref.load %arg2[%c54] : memref<98xf32, #tpu.memory_space<smem>>
    %78 = vector.broadcast %77 : f32 to vector<16x16xf32>
    %79 = arith.mulf %76, %78 : vector<16x16xf32>
    %80 = arith.addf %75, %79 : vector<16x16xf32>
    %81 = vector.extract_strided_slice %19 {offsets = [0, 6], sizes = [16, 16], strides = [1, 1]} : vector<22x22xf32> to vector<16x16xf32>
    %c6 = arith.constant 6 : index
    %82 = memref.load %arg2[%c6] : memref<98xf32, #tpu.memory_space<smem>>
    %83 = vector.broadcast %82 : f32 to vector<16x16xf32>
    %84 = arith.mulf %81, %83 : vector<16x16xf32>
    %85 = arith.addf %80, %84 : vector<16x16xf32>
    %86 = vector.extract_strided_slice %17 {offsets = [0, 6], sizes = [16, 16], strides = [1, 1]} : vector<22x22xf32> to vector<16x16xf32>
    %c55 = arith.constant 55 : index
    %87 = memref.load %arg2[%c55] : memref<98xf32, #tpu.memory_space<smem>>
    %88 = vector.broadcast %87 : f32 to vector<16x16xf32>
    %89 = arith.mulf %86, %88 : vector<16x16xf32>
    %90 = arith.addf %85, %89 : vector<16x16xf32>
    %91 = vector.extract_strided_slice %19 {offsets = [1, 0], sizes = [16, 16], strides = [1, 1]} : vector<22x22xf32> to vector<16x16xf32>
    %c7 = arith.constant 7 : index
    %92 = memref.load %arg2[%c7] : memref<98xf32, #tpu.memory_space<smem>>
    %93 = vector.broadcast %92 : f32 to vector<16x16xf32>
    %94 = arith.mulf %91, %93 : vector<16x16xf32>
    %95 = arith.addf %90, %94 : vector<16x16xf32>
    %96 = vector.extract_strided_slice %17 {offsets = [1, 0], sizes = [16, 16], strides = [1, 1]} : vector<22x22xf32> to vector<16x16xf32>
    %c56 = arith.constant 56 : index
    %97 = memref.load %arg2[%c56] : memref<98xf32, #tpu.memory_space<smem>>
    %98 = vector.broadcast %97 : f32 to vector<16x16xf32>
    %99 = arith.mulf %96, %98 : vector<16x16xf32>
    %100 = arith.addf %95, %99 : vector<16x16xf32>
    %101 = vector.extract_strided_slice %19 {offsets = [1, 1], sizes = [16, 16], strides = [1, 1]} : vector<22x22xf32> to vector<16x16xf32>
    %c8 = arith.constant 8 : index
    %102 = memref.load %arg2[%c8] : memref<98xf32, #tpu.memory_space<smem>>
    %103 = vector.broadcast %102 : f32 to vector<16x16xf32>
    %104 = arith.mulf %101, %103 : vector<16x16xf32>
    %105 = arith.addf %100, %104 : vector<16x16xf32>
    %106 = vector.extract_strided_slice %17 {offsets = [1, 1], sizes = [16, 16], strides = [1, 1]} : vector<22x22xf32> to vector<16x16xf32>
    %c57 = arith.constant 57 : index
    %107 = memref.load %arg2[%c57] : memref<98xf32, #tpu.memory_space<smem>>
    %108 = vector.broadcast %107 : f32 to vector<16x16xf32>
    %109 = arith.mulf %106, %108 : vector<16x16xf32>
    %110 = arith.addf %105, %109 : vector<16x16xf32>
    %111 = vector.extract_strided_slice %19 {offsets = [1, 2], sizes = [16, 16], strides = [1, 1]} : vector<22x22xf32> to vector<16x16xf32>
    %c9 = arith.constant 9 : index
    %112 = memref.load %arg2[%c9] : memref<98xf32, #tpu.memory_space<smem>>
    %113 = vector.broadcast %112 : f32 to vector<16x16xf32>
    %114 = arith.mulf %111, %113 : vector<16x16xf32>
    %115 = arith.addf %110, %114 : vector<16x16xf32>
    %116 = vector.extract_strided_slice %17 {offsets = [1, 2], sizes = [16, 16], strides = [1, 1]} : vector<22x22xf32> to vector<16x16xf32>
    %c58 = arith.constant 58 : index
    %117 = memref.load %arg2[%c58] : memref<98xf32, #tpu.memory_space<smem>>
    %118 = vector.broadcast %117 : f32 to vector<16x16xf32>
    %119 = arith.mulf %116, %118 : vector<16x16xf32>
    %120 = arith.addf %115, %119 : vector<16x16xf32>
    %121 = vector.extract_strided_slice %19 {offsets = [1, 3], sizes = [16, 16], strides = [1, 1]} : vector<22x22xf32> to vector<16x16xf32>
    %c10 = arith.constant 10 : index
    %122 = memref.load %arg2[%c10] : memref<98xf32, #tpu.memory_space<smem>>
    %123 = vector.broadcast %122 : f32 to vector<16x16xf32>
    %124 = arith.mulf %121, %123 : vector<16x16xf32>
    %125 = arith.addf %120, %124 : vector<16x16xf32>
    %126 = vector.extract_strided_slice %17 {offsets = [1, 3], sizes = [16, 16], strides = [1, 1]} : vector<22x22xf32> to vector<16x16xf32>
    %c59 = arith.constant 59 : index
    %127 = memref.load %arg2[%c59] : memref<98xf32, #tpu.memory_space<smem>>
    %128 = vector.broadcast %127 : f32 to vector<16x16xf32>
    %129 = arith.mulf %126, %128 : vector<16x16xf32>
    %130 = arith.addf %125, %129 : vector<16x16xf32>
    %131 = vector.extract_strided_slice %19 {offsets = [1, 4], sizes = [16, 16], strides = [1, 1]} : vector<22x22xf32> to vector<16x16xf32>
    %c11 = arith.constant 11 : index
    %132 = memref.load %arg2[%c11] : memref<98xf32, #tpu.memory_space<smem>>
    %133 = vector.broadcast %132 : f32 to vector<16x16xf32>
    %134 = arith.mulf %131, %133 : vector<16x16xf32>
    %135 = arith.addf %130, %134 : vector<16x16xf32>
    %136 = vector.extract_strided_slice %17 {offsets = [1, 4], sizes = [16, 16], strides = [1, 1]} : vector<22x22xf32> to vector<16x16xf32>
    %c60 = arith.constant 60 : index
    %137 = memref.load %arg2[%c60] : memref<98xf32, #tpu.memory_space<smem>>
    %138 = vector.broadcast %137 : f32 to vector<16x16xf32>
    %139 = arith.mulf %136, %138 : vector<16x16xf32>
    %140 = arith.addf %135, %139 : vector<16x16xf32>
    %141 = vector.extract_strided_slice %19 {offsets = [1, 5], sizes = [16, 16], strides = [1, 1]} : vector<22x22xf32> to vector<16x16xf32>
    %c12 = arith.constant 12 : index
    %142 = memref.load %arg2[%c12] : memref<98xf32, #tpu.memory_space<smem>>
    %143 = vector.broadcast %142 : f32 to vector<16x16xf32>
    %144 = arith.mulf %141, %143 : vector<16x16xf32>
    %145 = arith.addf %140, %144 : vector<16x16xf32>
    %146 = vector.extract_strided_slice %17 {offsets = [1, 5], sizes = [16, 16], strides = [1, 1]} : vector<22x22xf32> to vector<16x16xf32>
    %c61 = arith.constant 61 : index
    %147 = memref.load %arg2[%c61] : memref<98xf32, #tpu.memory_space<smem>>
    %148 = vector.broadcast %147 : f32 to vector<16x16xf32>
    %149 = arith.mulf %146, %148 : vector<16x16xf32>
    %150 = arith.addf %145, %149 : vector<16x16xf32>
    %151 = vector.extract_strided_slice %19 {offsets = [1, 6], sizes = [16, 16], strides = [1, 1]} : vector<22x22xf32> to vector<16x16xf32>
    %c13 = arith.constant 13 : index
    %152 = memref.load %arg2[%c13] : memref<98xf32, #tpu.memory_space<smem>>
    %153 = vector.broadcast %152 : f32 to vector<16x16xf32>
    %154 = arith.mulf %151, %153 : vector<16x16xf32>
    %155 = arith.addf %150, %154 : vector<16x16xf32>
    %156 = vector.extract_strided_slice %17 {offsets = [1, 6], sizes = [16, 16], strides = [1, 1]} : vector<22x22xf32> to vector<16x16xf32>
    %c62 = arith.constant 62 : index
    %157 = memref.load %arg2[%c62] : memref<98xf32, #tpu.memory_space<smem>>
    %158 = vector.broadcast %157 : f32 to vector<16x16xf32>
    %159 = arith.mulf %156, %158 : vector<16x16xf32>
    %160 = arith.addf %155, %159 : vector<16x16xf32>
    %161 = vector.extract_strided_slice %19 {offsets = [2, 0], sizes = [16, 16], strides = [1, 1]} : vector<22x22xf32> to vector<16x16xf32>
    %c14 = arith.constant 14 : index
    %162 = memref.load %arg2[%c14] : memref<98xf32, #tpu.memory_space<smem>>
    %163 = vector.broadcast %162 : f32 to vector<16x16xf32>
    %164 = arith.mulf %161, %163 : vector<16x16xf32>
    %165 = arith.addf %160, %164 : vector<16x16xf32>
    %166 = vector.extract_strided_slice %17 {offsets = [2, 0], sizes = [16, 16], strides = [1, 1]} : vector<22x22xf32> to vector<16x16xf32>
    %c63 = arith.constant 63 : index
    %167 = memref.load %arg2[%c63] : memref<98xf32, #tpu.memory_space<smem>>
    %168 = vector.broadcast %167 : f32 to vector<16x16xf32>
    %169 = arith.mulf %166, %168 : vector<16x16xf32>
    %170 = arith.addf %165, %169 : vector<16x16xf32>
    %171 = vector.extract_strided_slice %19 {offsets = [2, 1], sizes = [16, 16], strides = [1, 1]} : vector<22x22xf32> to vector<16x16xf32>
    %c15 = arith.constant 15 : index
    %172 = memref.load %arg2[%c15] : memref<98xf32, #tpu.memory_space<smem>>
    %173 = vector.broadcast %172 : f32 to vector<16x16xf32>
    %174 = arith.mulf %171, %173 : vector<16x16xf32>
    %175 = arith.addf %170, %174 : vector<16x16xf32>
    %176 = vector.extract_strided_slice %17 {offsets = [2, 1], sizes = [16, 16], strides = [1, 1]} : vector<22x22xf32> to vector<16x16xf32>
    %c64 = arith.constant 64 : index
    %177 = memref.load %arg2[%c64] : memref<98xf32, #tpu.memory_space<smem>>
    %178 = vector.broadcast %177 : f32 to vector<16x16xf32>
    %179 = arith.mulf %176, %178 : vector<16x16xf32>
    %180 = arith.addf %175, %179 : vector<16x16xf32>
    %181 = vector.extract_strided_slice %19 {offsets = [2, 2], sizes = [16, 16], strides = [1, 1]} : vector<22x22xf32> to vector<16x16xf32>
    %c16 = arith.constant 16 : index
    %182 = memref.load %arg2[%c16] : memref<98xf32, #tpu.memory_space<smem>>
    %183 = vector.broadcast %182 : f32 to vector<16x16xf32>
    %184 = arith.mulf %181, %183 : vector<16x16xf32>
    %185 = arith.addf %180, %184 : vector<16x16xf32>
    %186 = vector.extract_strided_slice %17 {offsets = [2, 2], sizes = [16, 16], strides = [1, 1]} : vector<22x22xf32> to vector<16x16xf32>
    %c65 = arith.constant 65 : index
    %187 = memref.load %arg2[%c65] : memref<98xf32, #tpu.memory_space<smem>>
    %188 = vector.broadcast %187 : f32 to vector<16x16xf32>
    %189 = arith.mulf %186, %188 : vector<16x16xf32>
    %190 = arith.addf %185, %189 : vector<16x16xf32>
    %191 = vector.extract_strided_slice %19 {offsets = [2, 3], sizes = [16, 16], strides = [1, 1]} : vector<22x22xf32> to vector<16x16xf32>
    %c17 = arith.constant 17 : index
    %192 = memref.load %arg2[%c17] : memref<98xf32, #tpu.memory_space<smem>>
    %193 = vector.broadcast %192 : f32 to vector<16x16xf32>
    %194 = arith.mulf %191, %193 : vector<16x16xf32>
    %195 = arith.addf %190, %194 : vector<16x16xf32>
    %196 = vector.extract_strided_slice %17 {offsets = [2, 3], sizes = [16, 16], strides = [1, 1]} : vector<22x22xf32> to vector<16x16xf32>
    %c66 = arith.constant 66 : index
    %197 = memref.load %arg2[%c66] : memref<98xf32, #tpu.memory_space<smem>>
    %198 = vector.broadcast %197 : f32 to vector<16x16xf32>
    %199 = arith.mulf %196, %198 : vector<16x16xf32>
    %200 = arith.addf %195, %199 : vector<16x16xf32>
    %201 = vector.extract_strided_slice %19 {offsets = [2, 4], sizes = [16, 16], strides = [1, 1]} : vector<22x22xf32> to vector<16x16xf32>
    %c18 = arith.constant 18 : index
    %202 = memref.load %arg2[%c18] : memref<98xf32, #tpu.memory_space<smem>>
    %203 = vector.broadcast %202 : f32 to vector<16x16xf32>
    %204 = arith.mulf %201, %203 : vector<16x16xf32>
    %205 = arith.addf %200, %204 : vector<16x16xf32>
    %206 = vector.extract_strided_slice %17 {offsets = [2, 4], sizes = [16, 16], strides = [1, 1]} : vector<22x22xf32> to vector<16x16xf32>
    %c67 = arith.constant 67 : index
    %207 = memref.load %arg2[%c67] : memref<98xf32, #tpu.memory_space<smem>>
    %208 = vector.broadcast %207 : f32 to vector<16x16xf32>
    %209 = arith.mulf %206, %208 : vector<16x16xf32>
    %210 = arith.addf %205, %209 : vector<16x16xf32>
    %211 = vector.extract_strided_slice %19 {offsets = [2, 5], sizes = [16, 16], strides = [1, 1]} : vector<22x22xf32> to vector<16x16xf32>
    %c19 = arith.constant 19 : index
    %212 = memref.load %arg2[%c19] : memref<98xf32, #tpu.memory_space<smem>>
    %213 = vector.broadcast %212 : f32 to vector<16x16xf32>
    %214 = arith.mulf %211, %213 : vector<16x16xf32>
    %215 = arith.addf %210, %214 : vector<16x16xf32>
    %216 = vector.extract_strided_slice %17 {offsets = [2, 5], sizes = [16, 16], strides = [1, 1]} : vector<22x22xf32> to vector<16x16xf32>
    %c68 = arith.constant 68 : index
    %217 = memref.load %arg2[%c68] : memref<98xf32, #tpu.memory_space<smem>>
    %218 = vector.broadcast %217 : f32 to vector<16x16xf32>
    %219 = arith.mulf %216, %218 : vector<16x16xf32>
    %220 = arith.addf %215, %219 : vector<16x16xf32>
    %221 = vector.extract_strided_slice %19 {offsets = [2, 6], sizes = [16, 16], strides = [1, 1]} : vector<22x22xf32> to vector<16x16xf32>
    %c20 = arith.constant 20 : index
    %222 = memref.load %arg2[%c20] : memref<98xf32, #tpu.memory_space<smem>>
    %223 = vector.broadcast %222 : f32 to vector<16x16xf32>
    %224 = arith.mulf %221, %223 : vector<16x16xf32>
    %225 = arith.addf %220, %224 : vector<16x16xf32>
    %226 = vector.extract_strided_slice %17 {offsets = [2, 6], sizes = [16, 16], strides = [1, 1]} : vector<22x22xf32> to vector<16x16xf32>
    %c69 = arith.constant 69 : index
    %227 = memref.load %arg2[%c69] : memref<98xf32, #tpu.memory_space<smem>>
    %228 = vector.broadcast %227 : f32 to vector<16x16xf32>
    %229 = arith.mulf %226, %228 : vector<16x16xf32>
    %230 = arith.addf %225, %229 : vector<16x16xf32>
    %231 = vector.extract_strided_slice %19 {offsets = [3, 0], sizes = [16, 16], strides = [1, 1]} : vector<22x22xf32> to vector<16x16xf32>
    %c21 = arith.constant 21 : index
    %232 = memref.load %arg2[%c21] : memref<98xf32, #tpu.memory_space<smem>>
    %233 = vector.broadcast %232 : f32 to vector<16x16xf32>
    %234 = arith.mulf %231, %233 : vector<16x16xf32>
    %235 = arith.addf %230, %234 : vector<16x16xf32>
    %236 = vector.extract_strided_slice %17 {offsets = [3, 0], sizes = [16, 16], strides = [1, 1]} : vector<22x22xf32> to vector<16x16xf32>
    %c70 = arith.constant 70 : index
    %237 = memref.load %arg2[%c70] : memref<98xf32, #tpu.memory_space<smem>>
    %238 = vector.broadcast %237 : f32 to vector<16x16xf32>
    %239 = arith.mulf %236, %238 : vector<16x16xf32>
    %240 = arith.addf %235, %239 : vector<16x16xf32>
    %241 = vector.extract_strided_slice %19 {offsets = [3, 1], sizes = [16, 16], strides = [1, 1]} : vector<22x22xf32> to vector<16x16xf32>
    %c22 = arith.constant 22 : index
    %242 = memref.load %arg2[%c22] : memref<98xf32, #tpu.memory_space<smem>>
    %243 = vector.broadcast %242 : f32 to vector<16x16xf32>
    %244 = arith.mulf %241, %243 : vector<16x16xf32>
    %245 = arith.addf %240, %244 : vector<16x16xf32>
    %246 = vector.extract_strided_slice %17 {offsets = [3, 1], sizes = [16, 16], strides = [1, 1]} : vector<22x22xf32> to vector<16x16xf32>
    %c71 = arith.constant 71 : index
    %247 = memref.load %arg2[%c71] : memref<98xf32, #tpu.memory_space<smem>>
    %248 = vector.broadcast %247 : f32 to vector<16x16xf32>
    %249 = arith.mulf %246, %248 : vector<16x16xf32>
    %250 = arith.addf %245, %249 : vector<16x16xf32>
    %251 = vector.extract_strided_slice %19 {offsets = [3, 2], sizes = [16, 16], strides = [1, 1]} : vector<22x22xf32> to vector<16x16xf32>
    %c23 = arith.constant 23 : index
    %252 = memref.load %arg2[%c23] : memref<98xf32, #tpu.memory_space<smem>>
    %253 = vector.broadcast %252 : f32 to vector<16x16xf32>
    %254 = arith.mulf %251, %253 : vector<16x16xf32>
    %255 = arith.addf %250, %254 : vector<16x16xf32>
    %256 = vector.extract_strided_slice %17 {offsets = [3, 2], sizes = [16, 16], strides = [1, 1]} : vector<22x22xf32> to vector<16x16xf32>
    %c72 = arith.constant 72 : index
    %257 = memref.load %arg2[%c72] : memref<98xf32, #tpu.memory_space<smem>>
    %258 = vector.broadcast %257 : f32 to vector<16x16xf32>
    %259 = arith.mulf %256, %258 : vector<16x16xf32>
    %260 = arith.addf %255, %259 : vector<16x16xf32>
    %261 = vector.extract_strided_slice %19 {offsets = [3, 3], sizes = [16, 16], strides = [1, 1]} : vector<22x22xf32> to vector<16x16xf32>
    %c24 = arith.constant 24 : index
    %262 = memref.load %arg2[%c24] : memref<98xf32, #tpu.memory_space<smem>>
    %263 = vector.broadcast %262 : f32 to vector<16x16xf32>
    %264 = arith.mulf %261, %263 : vector<16x16xf32>
    %265 = arith.addf %260, %264 : vector<16x16xf32>
    %266 = vector.extract_strided_slice %17 {offsets = [3, 3], sizes = [16, 16], strides = [1, 1]} : vector<22x22xf32> to vector<16x16xf32>
    %c73 = arith.constant 73 : index
    %267 = memref.load %arg2[%c73] : memref<98xf32, #tpu.memory_space<smem>>
    %268 = vector.broadcast %267 : f32 to vector<16x16xf32>
    %269 = arith.mulf %266, %268 : vector<16x16xf32>
    %270 = arith.addf %265, %269 : vector<16x16xf32>
    %271 = vector.extract_strided_slice %19 {offsets = [3, 4], sizes = [16, 16], strides = [1, 1]} : vector<22x22xf32> to vector<16x16xf32>
    %c25 = arith.constant 25 : index
    %272 = memref.load %arg2[%c25] : memref<98xf32, #tpu.memory_space<smem>>
    %273 = vector.broadcast %272 : f32 to vector<16x16xf32>
    %274 = arith.mulf %271, %273 : vector<16x16xf32>
    %275 = arith.addf %270, %274 : vector<16x16xf32>
    %276 = vector.extract_strided_slice %17 {offsets = [3, 4], sizes = [16, 16], strides = [1, 1]} : vector<22x22xf32> to vector<16x16xf32>
    %c74 = arith.constant 74 : index
    %277 = memref.load %arg2[%c74] : memref<98xf32, #tpu.memory_space<smem>>
    %278 = vector.broadcast %277 : f32 to vector<16x16xf32>
    %279 = arith.mulf %276, %278 : vector<16x16xf32>
    %280 = arith.addf %275, %279 : vector<16x16xf32>
    %281 = vector.extract_strided_slice %19 {offsets = [3, 5], sizes = [16, 16], strides = [1, 1]} : vector<22x22xf32> to vector<16x16xf32>
    %c26 = arith.constant 26 : index
    %282 = memref.load %arg2[%c26] : memref<98xf32, #tpu.memory_space<smem>>
    %283 = vector.broadcast %282 : f32 to vector<16x16xf32>
    %284 = arith.mulf %281, %283 : vector<16x16xf32>
    %285 = arith.addf %280, %284 : vector<16x16xf32>
    %286 = vector.extract_strided_slice %17 {offsets = [3, 5], sizes = [16, 16], strides = [1, 1]} : vector<22x22xf32> to vector<16x16xf32>
    %c75 = arith.constant 75 : index
    %287 = memref.load %arg2[%c75] : memref<98xf32, #tpu.memory_space<smem>>
    %288 = vector.broadcast %287 : f32 to vector<16x16xf32>
    %289 = arith.mulf %286, %288 : vector<16x16xf32>
    %290 = arith.addf %285, %289 : vector<16x16xf32>
    %291 = vector.extract_strided_slice %19 {offsets = [3, 6], sizes = [16, 16], strides = [1, 1]} : vector<22x22xf32> to vector<16x16xf32>
    %c27 = arith.constant 27 : index
    %292 = memref.load %arg2[%c27] : memref<98xf32, #tpu.memory_space<smem>>
    %293 = vector.broadcast %292 : f32 to vector<16x16xf32>
    %294 = arith.mulf %291, %293 : vector<16x16xf32>
    %295 = arith.addf %290, %294 : vector<16x16xf32>
    %296 = vector.extract_strided_slice %17 {offsets = [3, 6], sizes = [16, 16], strides = [1, 1]} : vector<22x22xf32> to vector<16x16xf32>
    %c76 = arith.constant 76 : index
    %297 = memref.load %arg2[%c76] : memref<98xf32, #tpu.memory_space<smem>>
    %298 = vector.broadcast %297 : f32 to vector<16x16xf32>
    %299 = arith.mulf %296, %298 : vector<16x16xf32>
    %300 = arith.addf %295, %299 : vector<16x16xf32>
    %301 = vector.extract_strided_slice %19 {offsets = [4, 0], sizes = [16, 16], strides = [1, 1]} : vector<22x22xf32> to vector<16x16xf32>
    %c28 = arith.constant 28 : index
    %302 = memref.load %arg2[%c28] : memref<98xf32, #tpu.memory_space<smem>>
    %303 = vector.broadcast %302 : f32 to vector<16x16xf32>
    %304 = arith.mulf %301, %303 : vector<16x16xf32>
    %305 = arith.addf %300, %304 : vector<16x16xf32>
    %306 = vector.extract_strided_slice %17 {offsets = [4, 0], sizes = [16, 16], strides = [1, 1]} : vector<22x22xf32> to vector<16x16xf32>
    %c77 = arith.constant 77 : index
    %307 = memref.load %arg2[%c77] : memref<98xf32, #tpu.memory_space<smem>>
    %308 = vector.broadcast %307 : f32 to vector<16x16xf32>
    %309 = arith.mulf %306, %308 : vector<16x16xf32>
    %310 = arith.addf %305, %309 : vector<16x16xf32>
    %311 = vector.extract_strided_slice %19 {offsets = [4, 1], sizes = [16, 16], strides = [1, 1]} : vector<22x22xf32> to vector<16x16xf32>
    %c29 = arith.constant 29 : index
    %312 = memref.load %arg2[%c29] : memref<98xf32, #tpu.memory_space<smem>>
    %313 = vector.broadcast %312 : f32 to vector<16x16xf32>
    %314 = arith.mulf %311, %313 : vector<16x16xf32>
    %315 = arith.addf %310, %314 : vector<16x16xf32>
    %316 = vector.extract_strided_slice %17 {offsets = [4, 1], sizes = [16, 16], strides = [1, 1]} : vector<22x22xf32> to vector<16x16xf32>
    %c78 = arith.constant 78 : index
    %317 = memref.load %arg2[%c78] : memref<98xf32, #tpu.memory_space<smem>>
    %318 = vector.broadcast %317 : f32 to vector<16x16xf32>
    %319 = arith.mulf %316, %318 : vector<16x16xf32>
    %320 = arith.addf %315, %319 : vector<16x16xf32>
    %321 = vector.extract_strided_slice %19 {offsets = [4, 2], sizes = [16, 16], strides = [1, 1]} : vector<22x22xf32> to vector<16x16xf32>
    %c30 = arith.constant 30 : index
    %322 = memref.load %arg2[%c30] : memref<98xf32, #tpu.memory_space<smem>>
    %323 = vector.broadcast %322 : f32 to vector<16x16xf32>
    %324 = arith.mulf %321, %323 : vector<16x16xf32>
    %325 = arith.addf %320, %324 : vector<16x16xf32>
    %326 = vector.extract_strided_slice %17 {offsets = [4, 2], sizes = [16, 16], strides = [1, 1]} : vector<22x22xf32> to vector<16x16xf32>
    %c79 = arith.constant 79 : index
    %327 = memref.load %arg2[%c79] : memref<98xf32, #tpu.memory_space<smem>>
    %328 = vector.broadcast %327 : f32 to vector<16x16xf32>
    %329 = arith.mulf %326, %328 : vector<16x16xf32>
    %330 = arith.addf %325, %329 : vector<16x16xf32>
    %331 = vector.extract_strided_slice %19 {offsets = [4, 3], sizes = [16, 16], strides = [1, 1]} : vector<22x22xf32> to vector<16x16xf32>
    %c31 = arith.constant 31 : index
    %332 = memref.load %arg2[%c31] : memref<98xf32, #tpu.memory_space<smem>>
    %333 = vector.broadcast %332 : f32 to vector<16x16xf32>
    %334 = arith.mulf %331, %333 : vector<16x16xf32>
    %335 = arith.addf %330, %334 : vector<16x16xf32>
    %336 = vector.extract_strided_slice %17 {offsets = [4, 3], sizes = [16, 16], strides = [1, 1]} : vector<22x22xf32> to vector<16x16xf32>
    %c80 = arith.constant 80 : index
    %337 = memref.load %arg2[%c80] : memref<98xf32, #tpu.memory_space<smem>>
    %338 = vector.broadcast %337 : f32 to vector<16x16xf32>
    %339 = arith.mulf %336, %338 : vector<16x16xf32>
    %340 = arith.addf %335, %339 : vector<16x16xf32>
    %341 = vector.extract_strided_slice %19 {offsets = [4, 4], sizes = [16, 16], strides = [1, 1]} : vector<22x22xf32> to vector<16x16xf32>
    %c32 = arith.constant 32 : index
    %342 = memref.load %arg2[%c32] : memref<98xf32, #tpu.memory_space<smem>>
    %343 = vector.broadcast %342 : f32 to vector<16x16xf32>
    %344 = arith.mulf %341, %343 : vector<16x16xf32>
    %345 = arith.addf %340, %344 : vector<16x16xf32>
    %346 = vector.extract_strided_slice %17 {offsets = [4, 4], sizes = [16, 16], strides = [1, 1]} : vector<22x22xf32> to vector<16x16xf32>
    %c81 = arith.constant 81 : index
    %347 = memref.load %arg2[%c81] : memref<98xf32, #tpu.memory_space<smem>>
    %348 = vector.broadcast %347 : f32 to vector<16x16xf32>
    %349 = arith.mulf %346, %348 : vector<16x16xf32>
    %350 = arith.addf %345, %349 : vector<16x16xf32>
    %351 = vector.extract_strided_slice %19 {offsets = [4, 5], sizes = [16, 16], strides = [1, 1]} : vector<22x22xf32> to vector<16x16xf32>
    %c33 = arith.constant 33 : index
    %352 = memref.load %arg2[%c33] : memref<98xf32, #tpu.memory_space<smem>>
    %353 = vector.broadcast %352 : f32 to vector<16x16xf32>
    %354 = arith.mulf %351, %353 : vector<16x16xf32>
    %355 = arith.addf %350, %354 : vector<16x16xf32>
    %356 = vector.extract_strided_slice %17 {offsets = [4, 5], sizes = [16, 16], strides = [1, 1]} : vector<22x22xf32> to vector<16x16xf32>
    %c82 = arith.constant 82 : index
    %357 = memref.load %arg2[%c82] : memref<98xf32, #tpu.memory_space<smem>>
    %358 = vector.broadcast %357 : f32 to vector<16x16xf32>
    %359 = arith.mulf %356, %358 : vector<16x16xf32>
    %360 = arith.addf %355, %359 : vector<16x16xf32>
    %361 = vector.extract_strided_slice %19 {offsets = [4, 6], sizes = [16, 16], strides = [1, 1]} : vector<22x22xf32> to vector<16x16xf32>
    %c34 = arith.constant 34 : index
    %362 = memref.load %arg2[%c34] : memref<98xf32, #tpu.memory_space<smem>>
    %363 = vector.broadcast %362 : f32 to vector<16x16xf32>
    %364 = arith.mulf %361, %363 : vector<16x16xf32>
    %365 = arith.addf %360, %364 : vector<16x16xf32>
    %366 = vector.extract_strided_slice %17 {offsets = [4, 6], sizes = [16, 16], strides = [1, 1]} : vector<22x22xf32> to vector<16x16xf32>
    %c83 = arith.constant 83 : index
    %367 = memref.load %arg2[%c83] : memref<98xf32, #tpu.memory_space<smem>>
    %368 = vector.broadcast %367 : f32 to vector<16x16xf32>
    %369 = arith.mulf %366, %368 : vector<16x16xf32>
    %370 = arith.addf %365, %369 : vector<16x16xf32>
    %371 = vector.extract_strided_slice %19 {offsets = [5, 0], sizes = [16, 16], strides = [1, 1]} : vector<22x22xf32> to vector<16x16xf32>
    %c35 = arith.constant 35 : index
    %372 = memref.load %arg2[%c35] : memref<98xf32, #tpu.memory_space<smem>>
    %373 = vector.broadcast %372 : f32 to vector<16x16xf32>
    %374 = arith.mulf %371, %373 : vector<16x16xf32>
    %375 = arith.addf %370, %374 : vector<16x16xf32>
    %376 = vector.extract_strided_slice %17 {offsets = [5, 0], sizes = [16, 16], strides = [1, 1]} : vector<22x22xf32> to vector<16x16xf32>
    %c84 = arith.constant 84 : index
    %377 = memref.load %arg2[%c84] : memref<98xf32, #tpu.memory_space<smem>>
    %378 = vector.broadcast %377 : f32 to vector<16x16xf32>
    %379 = arith.mulf %376, %378 : vector<16x16xf32>
    %380 = arith.addf %375, %379 : vector<16x16xf32>
    %381 = vector.extract_strided_slice %19 {offsets = [5, 1], sizes = [16, 16], strides = [1, 1]} : vector<22x22xf32> to vector<16x16xf32>
    %c36 = arith.constant 36 : index
    %382 = memref.load %arg2[%c36] : memref<98xf32, #tpu.memory_space<smem>>
    %383 = vector.broadcast %382 : f32 to vector<16x16xf32>
    %384 = arith.mulf %381, %383 : vector<16x16xf32>
    %385 = arith.addf %380, %384 : vector<16x16xf32>
    %386 = vector.extract_strided_slice %17 {offsets = [5, 1], sizes = [16, 16], strides = [1, 1]} : vector<22x22xf32> to vector<16x16xf32>
    %c85 = arith.constant 85 : index
    %387 = memref.load %arg2[%c85] : memref<98xf32, #tpu.memory_space<smem>>
    %388 = vector.broadcast %387 : f32 to vector<16x16xf32>
    %389 = arith.mulf %386, %388 : vector<16x16xf32>
    %390 = arith.addf %385, %389 : vector<16x16xf32>
    %391 = vector.extract_strided_slice %19 {offsets = [5, 2], sizes = [16, 16], strides = [1, 1]} : vector<22x22xf32> to vector<16x16xf32>
    %c37 = arith.constant 37 : index
    %392 = memref.load %arg2[%c37] : memref<98xf32, #tpu.memory_space<smem>>
    %393 = vector.broadcast %392 : f32 to vector<16x16xf32>
    %394 = arith.mulf %391, %393 : vector<16x16xf32>
    %395 = arith.addf %390, %394 : vector<16x16xf32>
    %396 = vector.extract_strided_slice %17 {offsets = [5, 2], sizes = [16, 16], strides = [1, 1]} : vector<22x22xf32> to vector<16x16xf32>
    %c86 = arith.constant 86 : index
    %397 = memref.load %arg2[%c86] : memref<98xf32, #tpu.memory_space<smem>>
    %398 = vector.broadcast %397 : f32 to vector<16x16xf32>
    %399 = arith.mulf %396, %398 : vector<16x16xf32>
    %400 = arith.addf %395, %399 : vector<16x16xf32>
    %401 = vector.extract_strided_slice %19 {offsets = [5, 3], sizes = [16, 16], strides = [1, 1]} : vector<22x22xf32> to vector<16x16xf32>
    %c38 = arith.constant 38 : index
    %402 = memref.load %arg2[%c38] : memref<98xf32, #tpu.memory_space<smem>>
    %403 = vector.broadcast %402 : f32 to vector<16x16xf32>
    %404 = arith.mulf %401, %403 : vector<16x16xf32>
    %405 = arith.addf %400, %404 : vector<16x16xf32>
    %406 = vector.extract_strided_slice %17 {offsets = [5, 3], sizes = [16, 16], strides = [1, 1]} : vector<22x22xf32> to vector<16x16xf32>
    %c87 = arith.constant 87 : index
    %407 = memref.load %arg2[%c87] : memref<98xf32, #tpu.memory_space<smem>>
    %408 = vector.broadcast %407 : f32 to vector<16x16xf32>
    %409 = arith.mulf %406, %408 : vector<16x16xf32>
    %410 = arith.addf %405, %409 : vector<16x16xf32>
    %411 = vector.extract_strided_slice %19 {offsets = [5, 4], sizes = [16, 16], strides = [1, 1]} : vector<22x22xf32> to vector<16x16xf32>
    %c39 = arith.constant 39 : index
    %412 = memref.load %arg2[%c39] : memref<98xf32, #tpu.memory_space<smem>>
    %413 = vector.broadcast %412 : f32 to vector<16x16xf32>
    %414 = arith.mulf %411, %413 : vector<16x16xf32>
    %415 = arith.addf %410, %414 : vector<16x16xf32>
    %416 = vector.extract_strided_slice %17 {offsets = [5, 4], sizes = [16, 16], strides = [1, 1]} : vector<22x22xf32> to vector<16x16xf32>
    %c88 = arith.constant 88 : index
    %417 = memref.load %arg2[%c88] : memref<98xf32, #tpu.memory_space<smem>>
    %418 = vector.broadcast %417 : f32 to vector<16x16xf32>
    %419 = arith.mulf %416, %418 : vector<16x16xf32>
    %420 = arith.addf %415, %419 : vector<16x16xf32>
    %421 = vector.extract_strided_slice %19 {offsets = [5, 5], sizes = [16, 16], strides = [1, 1]} : vector<22x22xf32> to vector<16x16xf32>
    %c40 = arith.constant 40 : index
    %422 = memref.load %arg2[%c40] : memref<98xf32, #tpu.memory_space<smem>>
    %423 = vector.broadcast %422 : f32 to vector<16x16xf32>
    %424 = arith.mulf %421, %423 : vector<16x16xf32>
    %425 = arith.addf %420, %424 : vector<16x16xf32>
    %426 = vector.extract_strided_slice %17 {offsets = [5, 5], sizes = [16, 16], strides = [1, 1]} : vector<22x22xf32> to vector<16x16xf32>
    %c89 = arith.constant 89 : index
    %427 = memref.load %arg2[%c89] : memref<98xf32, #tpu.memory_space<smem>>
    %428 = vector.broadcast %427 : f32 to vector<16x16xf32>
    %429 = arith.mulf %426, %428 : vector<16x16xf32>
    %430 = arith.addf %425, %429 : vector<16x16xf32>
    %431 = vector.extract_strided_slice %19 {offsets = [5, 6], sizes = [16, 16], strides = [1, 1]} : vector<22x22xf32> to vector<16x16xf32>
    %c41 = arith.constant 41 : index
    %432 = memref.load %arg2[%c41] : memref<98xf32, #tpu.memory_space<smem>>
    %433 = vector.broadcast %432 : f32 to vector<16x16xf32>
    %434 = arith.mulf %431, %433 : vector<16x16xf32>
    %435 = arith.addf %430, %434 : vector<16x16xf32>
    %436 = vector.extract_strided_slice %17 {offsets = [5, 6], sizes = [16, 16], strides = [1, 1]} : vector<22x22xf32> to vector<16x16xf32>
    %c90 = arith.constant 90 : index
    %437 = memref.load %arg2[%c90] : memref<98xf32, #tpu.memory_space<smem>>
    %438 = vector.broadcast %437 : f32 to vector<16x16xf32>
    %439 = arith.mulf %436, %438 : vector<16x16xf32>
    %440 = arith.addf %435, %439 : vector<16x16xf32>
    %441 = vector.extract_strided_slice %19 {offsets = [6, 0], sizes = [16, 16], strides = [1, 1]} : vector<22x22xf32> to vector<16x16xf32>
    %c42 = arith.constant 42 : index
    %442 = memref.load %arg2[%c42] : memref<98xf32, #tpu.memory_space<smem>>
    %443 = vector.broadcast %442 : f32 to vector<16x16xf32>
    %444 = arith.mulf %441, %443 : vector<16x16xf32>
    %445 = arith.addf %440, %444 : vector<16x16xf32>
    %446 = vector.extract_strided_slice %17 {offsets = [6, 0], sizes = [16, 16], strides = [1, 1]} : vector<22x22xf32> to vector<16x16xf32>
    %c91 = arith.constant 91 : index
    %447 = memref.load %arg2[%c91] : memref<98xf32, #tpu.memory_space<smem>>
    %448 = vector.broadcast %447 : f32 to vector<16x16xf32>
    %449 = arith.mulf %446, %448 : vector<16x16xf32>
    %450 = arith.addf %445, %449 : vector<16x16xf32>
    %451 = vector.extract_strided_slice %19 {offsets = [6, 1], sizes = [16, 16], strides = [1, 1]} : vector<22x22xf32> to vector<16x16xf32>
    %c43 = arith.constant 43 : index
    %452 = memref.load %arg2[%c43] : memref<98xf32, #tpu.memory_space<smem>>
    %453 = vector.broadcast %452 : f32 to vector<16x16xf32>
    %454 = arith.mulf %451, %453 : vector<16x16xf32>
    %455 = arith.addf %450, %454 : vector<16x16xf32>
    %456 = vector.extract_strided_slice %17 {offsets = [6, 1], sizes = [16, 16], strides = [1, 1]} : vector<22x22xf32> to vector<16x16xf32>
    %c92 = arith.constant 92 : index
    %457 = memref.load %arg2[%c92] : memref<98xf32, #tpu.memory_space<smem>>
    %458 = vector.broadcast %457 : f32 to vector<16x16xf32>
    %459 = arith.mulf %456, %458 : vector<16x16xf32>
    %460 = arith.addf %455, %459 : vector<16x16xf32>
    %461 = vector.extract_strided_slice %19 {offsets = [6, 2], sizes = [16, 16], strides = [1, 1]} : vector<22x22xf32> to vector<16x16xf32>
    %c44 = arith.constant 44 : index
    %462 = memref.load %arg2[%c44] : memref<98xf32, #tpu.memory_space<smem>>
    %463 = vector.broadcast %462 : f32 to vector<16x16xf32>
    %464 = arith.mulf %461, %463 : vector<16x16xf32>
    %465 = arith.addf %460, %464 : vector<16x16xf32>
    %466 = vector.extract_strided_slice %17 {offsets = [6, 2], sizes = [16, 16], strides = [1, 1]} : vector<22x22xf32> to vector<16x16xf32>
    %c93 = arith.constant 93 : index
    %467 = memref.load %arg2[%c93] : memref<98xf32, #tpu.memory_space<smem>>
    %468 = vector.broadcast %467 : f32 to vector<16x16xf32>
    %469 = arith.mulf %466, %468 : vector<16x16xf32>
    %470 = arith.addf %465, %469 : vector<16x16xf32>
    %471 = vector.extract_strided_slice %19 {offsets = [6, 3], sizes = [16, 16], strides = [1, 1]} : vector<22x22xf32> to vector<16x16xf32>
    %c45 = arith.constant 45 : index
    %472 = memref.load %arg2[%c45] : memref<98xf32, #tpu.memory_space<smem>>
    %473 = vector.broadcast %472 : f32 to vector<16x16xf32>
    %474 = arith.mulf %471, %473 : vector<16x16xf32>
    %475 = arith.addf %470, %474 : vector<16x16xf32>
    %476 = vector.extract_strided_slice %17 {offsets = [6, 3], sizes = [16, 16], strides = [1, 1]} : vector<22x22xf32> to vector<16x16xf32>
    %c94 = arith.constant 94 : index
    %477 = memref.load %arg2[%c94] : memref<98xf32, #tpu.memory_space<smem>>
    %478 = vector.broadcast %477 : f32 to vector<16x16xf32>
    %479 = arith.mulf %476, %478 : vector<16x16xf32>
    %480 = arith.addf %475, %479 : vector<16x16xf32>
    %481 = vector.extract_strided_slice %19 {offsets = [6, 4], sizes = [16, 16], strides = [1, 1]} : vector<22x22xf32> to vector<16x16xf32>
    %c46 = arith.constant 46 : index
    %482 = memref.load %arg2[%c46] : memref<98xf32, #tpu.memory_space<smem>>
    %483 = vector.broadcast %482 : f32 to vector<16x16xf32>
    %484 = arith.mulf %481, %483 : vector<16x16xf32>
    %485 = arith.addf %480, %484 : vector<16x16xf32>
    %486 = vector.extract_strided_slice %17 {offsets = [6, 4], sizes = [16, 16], strides = [1, 1]} : vector<22x22xf32> to vector<16x16xf32>
    %c95 = arith.constant 95 : index
    %487 = memref.load %arg2[%c95] : memref<98xf32, #tpu.memory_space<smem>>
    %488 = vector.broadcast %487 : f32 to vector<16x16xf32>
    %489 = arith.mulf %486, %488 : vector<16x16xf32>
    %490 = arith.addf %485, %489 : vector<16x16xf32>
    %491 = vector.extract_strided_slice %19 {offsets = [6, 5], sizes = [16, 16], strides = [1, 1]} : vector<22x22xf32> to vector<16x16xf32>
    %c47 = arith.constant 47 : index
    %492 = memref.load %arg2[%c47] : memref<98xf32, #tpu.memory_space<smem>>
    %493 = vector.broadcast %492 : f32 to vector<16x16xf32>
    %494 = arith.mulf %491, %493 : vector<16x16xf32>
    %495 = arith.addf %490, %494 : vector<16x16xf32>
    %496 = vector.extract_strided_slice %17 {offsets = [6, 5], sizes = [16, 16], strides = [1, 1]} : vector<22x22xf32> to vector<16x16xf32>
    %c96 = arith.constant 96 : index
    %497 = memref.load %arg2[%c96] : memref<98xf32, #tpu.memory_space<smem>>
    %498 = vector.broadcast %497 : f32 to vector<16x16xf32>
    %499 = arith.mulf %496, %498 : vector<16x16xf32>
    %500 = arith.addf %495, %499 : vector<16x16xf32>
    %501 = vector.extract_strided_slice %19 {offsets = [6, 6], sizes = [16, 16], strides = [1, 1]} : vector<22x22xf32> to vector<16x16xf32>
    %c48 = arith.constant 48 : index
    %502 = memref.load %arg2[%c48] : memref<98xf32, #tpu.memory_space<smem>>
    %503 = vector.broadcast %502 : f32 to vector<16x16xf32>
    %504 = arith.mulf %501, %503 : vector<16x16xf32>
    %505 = arith.addf %500, %504 : vector<16x16xf32>
    %506 = vector.extract_strided_slice %17 {offsets = [6, 6], sizes = [16, 16], strides = [1, 1]} : vector<22x22xf32> to vector<16x16xf32>
    %c97 = arith.constant 97 : index
    %507 = memref.load %arg2[%c97] : memref<98xf32, #tpu.memory_space<smem>>
    %508 = vector.broadcast %507 : f32 to vector<16x16xf32>
    %509 = arith.mulf %506, %508 : vector<16x16xf32>
    %510 = arith.addf %505, %509 : vector<16x16xf32>
    %511 = arith.negf %510 : vector<16x16xf32>
    %512 = math.exp %511 : vector<16x16xf32>
    %cst_5 = arith.constant 1.000000e+00 : f32
    %513 = vector.broadcast %cst_5 : f32 to vector<16x16xf32>
    %514 = arith.addf %513, %512 : vector<16x16xf32>
    %515 = arith.divf %513, %514 : vector<16x16xf32>
    %c0_6 = arith.constant 0 : index
    %c0_7 = arith.constant 0 : index
    %c0_8 = arith.constant 0 : index
    %516 = vector.load %arg3[%c0_6, %c0_7, %c0_8] : memref<1x16x16xf32, #tpu.memory_space<vmem>>, vector<1x16x16xf32>
    %517 = vector.shape_cast %516 : vector<1x16x16xf32> to vector<16x16xf32>
    %518 = vector.shape_cast %515 : vector<16x16xf32> to vector<1x16x16xf32>
    tpu.vector_store %arg3[%c0_6, %c0_7, %c0_8], %518 {strides = array<i32>} : memref<1x16x16xf32, #tpu.memory_space<vmem>>, vector<1x16x16xf32>,
    return
  }
  func.func @transform_0(%arg0: i32) -> (i32, i32, i32, i32) {
    %c0_i32 = arith.constant 0 : i32
    %c0_i32_0 = arith.constant 0 : i32
    %c0_i32_1 = arith.constant 0 : i32
    %c0_i32_2 = arith.constant 0 : i32
    return %arg0, %c0_i32, %c0_i32_0, %c0_i32_1 : i32, i32, i32, i32
  }
  func.func @transform_1(%arg0: i32) -> i32 {
    %c0_i32 = arith.constant 0 : i32
    %c0_i32_0 = arith.constant 0 : i32
    return %c0_i32 : i32
  }
  func.func @transform_2(%arg0: i32) -> (i32, i32, i32) {
    %c0_i32 = arith.constant 0 : i32
    %c0_i32_0 = arith.constant 0 : i32
    %c0_i32_1 = arith.constant 0 : i32
    return %arg0, %c0_i32, %c0_i32_0 : i32, i32, i32
  }
}

</mosaic_0001>

<bundles_post_ra>
// kernel: tpu_custom_call.1
= control target key start
LH: loop header
LB: loop body
LE: loop exit
PB: predicated region body
PF: predicated region fallthrough
CT: control target
= control target key end

     0   :  { %7 = vsyncpa [#allocation4], 0  ;;  %s3444_s0 = inlined_call_operand.vmem [shape: f32[2,4,22,22], index: 0, kind: input, shape index: {}]   ;;  %s3445_s1 = inlined_call_operand.vmem [shape: f32[98], index: 1, kind: input, shape index: {}]   ;;  %s3446_s2 = inlined_call_operand.hbm [shape: f32[2,16,16], index: 2, kind: output, shape index: {}]  }
   0x1   :  { %8 = vsyncpa [#allocation3], 0 }
   0x2   :  { %10 = vsyncpa [#allocation3 + $0x1], 0  ;;  %s2509_s9 = smov 0   ;;  %s2511_s10 = smov 0  }
   0x3   :  { %s2513_s11 = smov 0   ;;  %s2515_s12 = smov 0  }
   0x4 LB: > { %s2530_s13 = sadd.s32 4294967295, %s2483_s12   ;;  %s2222_s14 = sadd.s32 4294967294, %s2483_s12   ;;  %s2483_s12 = sphi %s2515_s12, %s3452_s12   ;;  %s2479_s11 = sphi %s2513_s11, %s3451_s11   ;;  %s2475_s10 = sphi %s2511_s10, %s3450_s10   ;;  %s2471_s9 = sphi %s2509_s9, %s3449_s9  }
   0x5   : > { %s2534_s15 = sadd.s32 1, %s2483_s12   ;;  %s70_s16 = sadd.s32 1, %s2479_s11 }
   0x6   : > { %s67_s17 = ssub.s32 %s2483_s12, %s2534_s15  ;;  %p80_p0 = scmp.ne.s32.totalorder %s2479_s11, %s2475_s10 }
   0x7   : > { %p68_p1 = scmp.eq.s32.totalorder %s67_s17, 0  ;;  %p81_p2 = scmp.eq.s32.totalorder %s2530_s13, 1 }
   0x8   : > { %p86_p3 = scmp.ne.s32.totalorder %s2475_s10, %s2471_s9  ;;  %p87_p4 = scmp.eq.s32.totalorder %s2222_s14, 1 }
   0x9   : > { %s2545_s18 = scalar_select %p68_p1, %s2479_s11, %s70_s16  }
   0xa   : > { %p2547_p5 = por %p81_p2, %p80_p0  ;;  %p2551_p6 = por %p87_p4, %p86_p3 }
   0xb   : > { %p2223_p7 = scmp.ge.s32.totalorder %s2483_s12, 1  ;;  %p94_p8 = scmp.lt.s32.totalorder %s2483_s12, 3 }
   0xc   : > { %p2350_p9 = scmp.eq.s32.totalorder %s2530_s13, 0  ;;  %s106_s23 = sshll.u32 %s3445_s1, 4  ;;  %s107_s23 = int_to_ptr.vmem [resolvable:$true] %s106_s23 }
   0xd   : > { %p95_p10 = pnand %p2223_p7, %p94_p8  ;;  %s2485_s24 = smov [#allocation2]  }
   0xf   : > { %p2342_p11 = pneg %p95_p10  ;;  %127 = sbr.rel (%p95_p10) target bundleno = 630 (0x276), region = 28 }
  0x11   : > { %p2343_p12 = pnand %p2350_p9, %p2342_p11 }
  0x13   : > { %2345 = dma.vmem_to_smem (!%p2343_p12), %s107_s23, 16, %s2485_s24, [#allocation4]  }
  0x14   : > { %2462 = dma.done.wait (%p2350_p9), [#allocation4], 16  }
  0x15   : > { %2464 = vsyncadd (%p2350_p9), [#allocation4], 4294967280 }
  0x16   : > { %134 = sfence }
  0x17   : > { %p151_p13 = scmp.lt.s32.totalorder %s2530_s13, 1  ;;  %s2562_s25 = sld [smem:[#allocation2 + $0x33]]  ;;  %vm377_vm0 = vcmask 1046528   ;;  %vm664_vm1 = vcmask 1045504   ;;  %vm951_vm2 = vcmask 1044480   ;;  %vm1238_vm3 = vcmask 1043456  }
  0x18   : > { %s2565_s27 = sld [smem:[#allocation2 + $0x32]]  ;;  %s2486_s6 = smov 126   ;;  %vm1525_vm4 = vcmask 1042432   ;;  %vm1812_vm5 = vcmask 1041408   ;;  %vm2129_vm8 = vcmask 130048  }
  0x19   : > { %s152_s26 = scalar_select %p151_p13, %s2530_s13, 1 }
  0x1a   : > { %s2572_s4 = sld [smem:[#allocation2 + $0x2]]  ;;  %s2487_s7 = smov 127  }
  0x1b   : > { %s2335_s28 = smul.u32 96, %s152_s26  ;;  %s2581_s5 = sld [smem:[#allocation2 + $0x1]] }
  0x1c   : > { %s2235_s8 = sld [smem:[#allocation2 + $0x3]]  ;;  %s2488_s17 = smov 125  }
  0x1d   : > { %s2570_s3 = scalar_lea.vmem %s3444_s0, %s2335_s28  ;;  %v244_v13 = vstv %s2562_s25  ;;  %s2236_s14 = sld [smem:[#allocation2 + $0x34]] }
  0x1e   : > { %v156_v0 = vld [vmem:[%s2570_s3] sm:$0xff]  ;;  %v157_v1 = vld [vmem:[%s2570_s3 + $0x8] sm:$0xff]  ;;  %v159_v2 = vld [vmem:[%s2570_s3 + $0x18] sm:$0xff]  ;;  %v216_v14 = vstv %s2565_s27  ;;  %s2237_s16 = sld [smem:[#allocation2 + $0x4]]  ;;  %s2489_s23 = smov 124  }
  0x1f   : > { %v160_v3 = vld [vmem:[%s2570_s3 + $0x20] sm:$0xff]  ;;  %v162_v4 = vld [vmem:[%s2570_s3 + $0x30] sm:$0xff]  ;;  %v171_v5 = vmax.f32 %v156_v0, %v159_v2  ;;  %v168_v6 = vadd.f32 %v159_v2, %v156_v0  ;;  %v163_v7 = vld [vmem:[%s2570_s3 + $0x38] sm:$0xff]  ;;  %s2238_s21 = sld [smem:[#allocation2 + $0x35]]  ;;  %s2490_s26 = smov 123  }
  0x20   : > { %v165_v8 = vld [vmem:[%s2570_s3 + $0x48] sm:$0xff]  ;;  %v172_v9 = vmax.f32 %v157_v1, %v160_v3  ;;  %v169_v10 = vadd.f32 %v160_v3, %v157_v1  ;;  %v166_v19 = vld [vmem:[%s2570_s3 + $0x50] sm:$0xff]  ;;  %v230_v20 = vstv %s2572_s4  ;;  %s2239_s22 = sld [smem:[#allocation2 + $0x5]]  ;;  %v164_v51 = vld [vmem:[%s2570_s3 + $0x40] sm:$0x3f] }
  0x21   : > { %v177_v11 = vmax.f32 %v171_v5, %v162_v4  ;;  %v174_v12 = vadd.f32 %v168_v6, %v162_v4  ;;  %v202_v27 = vstv %s2581_s5  ;;  %s2240_s24 = sld [smem:[#allocation2 + $0x36]]  ;;  %v158_v46 = vld [vmem:[%s2570_s3 + $0x10] sm:$0x3f]  ;;  %v161_v47 = vld [vmem:[%s2570_s3 + $0x28] sm:$0x3f] }
  0x22   : > { %v178_v15 = vmax.f32 %v172_v9, %v163_v7  ;;  %v175_v18 = vadd.f32 %v169_v10, %v163_v7  ;;  %v258_v34 = vstv %s2235_s8  ;;  %v170_v50 = vadd.f32 %v161_v47, %v158_v46  ;;  %s2241_s25 = sld [smem:[#allocation2 + $0x6]]  ;;  %v167_v55 = vld [vmem:[%s2570_s3 + $0x58] sm:$0x3f]  ;;  %s2491_s3 = smov 122  }
  0x23   : > { %v2585_v16 = vmax.f32 %v177_v11, %v165_v8  ;;  %v180_v17 = vadd.f32 %v174_v12, %v165_v8  ;;  %v272_v36 = vstv %s2236_s14  ;;  %s2242_s27 = sld [smem:[#allocation2 + $0x37]]  ;;  %v173_v0 = vmax.f32 %v158_v46, %v161_v47 }
  0x24   : > { %v2593_v24 = vmax.f32 %v178_v15, %v166_v19  ;;  %v181_v25 = vadd.f32 %v175_v18, %v166_v19  ;;  %v286_v40 = vstv %s2237_s16  ;;  %v176_v53 = vadd.f32 %v170_v50, %v164_v51  ;;  %s2245_s28 = sld [smem:[#allocation2 + $0x8]] }
  0x25   : > { %v245_v21 = vmul.f32 %v244_v13, %v2585_v16  ;;  %v217_v22 = vmul.f32 %v216_v14, %v2585_v16  ;;  %v2591_v23 = vmul.f32 0.25, %v180_v17  ;;  %v273_v37 = vmul.f32 %v272_v36, %v2585_v16  ;;  %s2246_s29 = sld [smem:[#allocation2 + $0x39]] }
  0x26   : > { %v218_v28 = vmul.f32 %v216_v14, %v2593_v24  ;;  %v2602_v30 = vmul.f32 0.25, %v181_v25  ;;  %v246_v32 = vmul.f32 %v244_v13, %v2593_v24  ;;  %v274_v39 = vmul.f32 %v272_v36, %v2593_v24  ;;  %s2247_s30 = sld [smem:[#allocation2 + $0x9]] }
  0x27   : > { %249 = vrot.lane.b32.xlu0 %v245_v21, %s2486_s6  ;;  %221 = vrot.lane.b32.xlu1 %v217_v22, %s2487_s7  ;;  %v231_v26 = vmul.f32 %v230_v20, %v2591_v23  ;;  %v203_v29 = vmul.f32 %v202_v27, %v2591_v23  ;;  %v259_v35 = vmul.f32 %v258_v34, %v2591_v23  ;;  %v300_v43 = vstv %s2238_s21  ;;  %s2248_s4 = sld [smem:[#allocation2 + $0x3a]] }
  0x28   : > { %v232_v31 = vmul.f32 %v230_v20, %v2602_v30  ;;  %v204_v33 = vmul.f32 %v202_v27, %v2602_v30  ;;  %v260_v38 = vmul.f32 %v258_v34, %v2602_v30  ;;  %v288_v41 = vmul.f32 %v286_v40, %v2602_v30  ;;  %s2249_s5 = sld [smem:[#allocation2 + $0xa]] }
  0x29   : > { %235 = vrot.lane.b32.xlu2 %v231_v26, %s2486_s6  ;;  %v287_v42 = vmul.f32 %v286_v40, %v2591_v23  ;;  %v301_v44 = vmul.f32 %v300_v43, %v2585_v16  ;;  %v314_v45 = vstv %s2239_s22  ;;  %v302_v49 = vmul.f32 %v300_v43, %v2593_v24  ;;  %s2250_s8 = sld [smem:[#allocation2 + $0x3b]] }
  0x2a   : > { %v315_v48 = vmul.f32 %v314_v45, %v2591_v23  ;;  %v316_v52 = vmul.f32 %v314_v45, %v2602_v30  ;;  %v328_v54 = vstv %s2240_s24  ;;  %v182_v58 = vadd.f32 %v176_v53, %v167_v55  ;;  %s2251_s14 = sld [smem:[#allocation2 + $0xb]] }
  0x2b   : > { %v330_v56 = vmul.f32 %v328_v54, %v2593_v24  ;;  %v329_v57 = vmul.f32 %v328_v54, %v2585_v16  ;;  %v342_v59 = vstv %s2241_s25  ;;  %v356_v61 = vstv %s2242_s27  ;;  %s2252_s16 = sld [smem:[#allocation2 + $0x3c]] }
  0x2c   : > { %v343_v60 = vmul.f32 %v342_v59, %v2591_v23  ;;  %v2641_v62 = vmul.f32 0.25, %v182_v58  ;;  %v405_v63 = vstv %s2245_s28  ;;  %v357_v1 = vmul.f32 %v356_v61, %v2585_v16  ;;  %s2253_s21 = sld [smem:[#allocation2 + $0xc]] }
  0x2d   : > { %v344_v2 = vmul.f32 %v342_v59, %v2602_v30  ;;  %v407_v3 = vmul.f32 %v405_v63, %v2602_v30  ;;  %v406_v5 = vmul.f32 %v405_v63, %v2591_v23  ;;  %v179_v6 = vmax.f32 %v173_v0, %v164_v51  ;;  %s2254_s22 = sld [smem:[#allocation2 + $0x3d]] }
  0x2e   : > { %v408_v4 = vmul.f32 %v405_v63, %v2641_v62  ;;  %v426_v7 = vstv %s2246_s29  ;;  %v358_v8 = vmul.f32 %v356_v61, %v2593_v24  ;;  %v447_v15 = vstv %s2247_s30  ;;  %s2255_s24 = sld [smem:[#allocation2 + $0xd]] }
  0x2f   : > { %223 = vrot.lane.b32.xlu1 %v218_v28, %s2487_s7  ;;  %207 = vrot.lane.b32.xlu0 %v203_v29, %s2487_s7  ;;  %v427_v9 = vmul.f32 %v426_v7, %v2585_v16  ;;  %v413_v10 = vrot.slane %v407_v3, 1  ;;  %v412_v12 = vrot.slane %v406_v5, 1  ;;  %v2653_v13 = vmax.f32 %v179_v6, %v167_v55  ;;  %s2256_s25 = sld [smem:[#allocation2 + $0x3e]] }
  0x30   : > { %v415_v11 = vrot.slane %v408_v4, 1  ;;  %v428_v14 = vmul.f32 %v426_v7, %v2593_v24  ;;  %v448_v20 = vmul.f32 %v447_v15, %v2591_v23  ;;  %v449_v21 = vmul.f32 %v447_v15, %v2602_v30  ;;  %s2259_s27 = sld [smem:[#allocation2 + $0xf]] }
  0x31   : > { %237 = vrot.lane.b32.xlu2 %v232_v31, %s2486_s6  ;;  %v433_v17 = vrot.slane %v427_v9, 1  ;;  %v414_v19 = vsel %vm377_vm0, %v412_v12, %v413_v10  ;;  %v429_v22 = vmul.f32 %v426_v7, %v2653_v13  ;;  %v450_v27 = vmul.f32 %v447_v15, %v2641_v62  ;;  %s2260_s28 = sld [smem:[#allocation2 + $0x40]] }
  0x32   : > { %v416_v18 = vsel %vm377_vm0, %v413_v10, %v415_v11  ;;  %v434_v25 = vrot.slane %v428_v14, 1  ;;  %v454_v28 = vrot.slane %v448_v20, 1  ;;  %v455_v29 = vrot.slane %v449_v21, 1  ;;  %s2261_s29 = sld [smem:[#allocation2 + $0x10]] }
  0x33   : > { %v436_v31 = vrot.slane %v429_v22, 1  ;;  %v510_v46 = vstv %s2250_s8  ;;  %v531_v59 = vstv %s2251_s14  ;;  %v552_v3 = vstv %s2252_s16  ;;  %s2740_s30 = sld [smem:[#allocation2]] }
  0x34   : > { %v435_v26 = vsel %vm377_vm0, %v433_v17, %v434_v25  ;;  %v511_v50 = vmul.f32 %v510_v46, %v2585_v16  ;;  %v512_v51 = vmul.f32 %v510_v46, %v2593_v24  ;;  %v513_v55 = vmul.f32 %v510_v46, %v2653_v13  ;;  %s2263_s8 = sld [smem:[#allocation2 + $0x11]] }
  0x35   : > { %v533_v61 = vmul.f32 %v531_v59, %v2602_v30  ;;  %v534_v63 = vmul.f32 %v531_v59, %v2641_v62  ;;  %v532_v0 = vmul.f32 %v531_v59, %v2591_v23  ;;  %v553_v5 = vmul.f32 %v552_v3, %v2585_v16  ;;  %s2264_s14 = sld [smem:[#allocation2 + $0x42]] }
  0x36   : > { %v554_v9 = vmul.f32 %v552_v3, %v2593_v24  ;;  %v573_v10 = vstv %s2253_s21  ;;  %s2265_s16 = sld [smem:[#allocation2 + $0x12]] }
  0x37   : > { %251 = vrot.lane.b32.xlu1 %v246_v32, %s2486_s6  ;;  %209 = vrot.lane.b32.xlu0 %v204_v33, %s2487_s7  ;;  %v468_v32 = vstv %s2248_s4  ;;  %v457_v33 = vrot.slane %v450_v27, 1  ;;  %v539_v6 = vrot.slane %v533_v61, 1  ;;  %v541_v7 = vrot.slane %v534_v63, 1  ;;  %s2742_s4 = sld [smem:[#allocation2 + $0x31]] }
  0x38   : > { %v470_v34 = vmul.f32 %v468_v32, %v2593_v24  ;;  %v469_v36 = vmul.f32 %v468_v32, %v2585_v16  ;;  %v559_v11 = vrot.slane %v553_v5, 1  ;;  %v574_v17 = vmul.f32 %v573_v10, %v2591_v23  ;;  %s2266_s21 = sld [smem:[#allocation2 + $0x43]] }
  0x39   : > { %263 = vrot.lane.b32.xlu2 %v259_v35, %s2488_s17  ;;  %v471_v35 = vmul.f32 %v468_v32, %v2653_v13  ;;  %v458_v40 = vsel %vm377_vm0, %v455_v29, %v457_v33  ;;  %v542_v12 = vsel %vm377_vm0, %v539_v6, %v541_v7  ;;  %v560_v20 = vrot.slane %v554_v9, 1 }
  0x3a   : > { %v576_v22 = vmul.f32 %v573_v10, %v2641_v62  ;;  %v713_v5 = vstv %s2260_s28  ;;  %s2833_s28 = sld [smem:[#allocation2 + $0x14]] }
  0x3b   : > { %v478_v43 = vrot.slane %v471_v35, 1  ;;  %v561_v21 = vsel %vm377_vm0, %v559_v11, %v560_v20  ;;  %v714_v7 = vmul.f32 %v713_v5, %v2585_v16  ;;  %v715_v11 = vmul.f32 %v713_v5, %v2593_v24 }
  0x3f   : > { %277 = vrot.lane.b32.xlu1 %v273_v37, %s2488_s17  ;;  %265 = vrot.lane.b32.xlu0 %v260_v38, %s2488_s17  ;;  %v456_v37 = vsel %vm377_vm0, %v454_v28, %v455_v29  ;;  %v437_v38 = vsel %vm377_vm0, %v434_v25, %v436_v31  ;;  %v580_v25 = vrot.slane %v574_v17, 1  ;;  %v594_v28 = vstv %s2254_s22  ;;  %s2267_s22 = sld [smem:[#allocation2 + $0x13]] }
  0x40   : > { %v583_v29 = vrot.slane %v576_v22, 1  ;;  %v596_v31 = vmul.f32 %v594_v28, %v2593_v24  ;;  %v597_v32 = vmul.f32 %v594_v28, %v2653_v13  ;;  %v595_v33 = vmul.f32 %v594_v28, %v2585_v16 }
  0x41   : > { %279 = vrot.lane.b32.xlu2 %v274_v39, %s2488_s17  ;;  %v489_v39 = vstv %s2249_s5  ;;  %s2262_s5 = sld [smem:[#allocation2 + $0x41]]  ;;  %v734_v17 = vstv %s2261_s29  ;;  %v716_v28 = vmul.f32 %v713_v5, %v2653_v13 }
  0x42   : > { %v491_v45 = vmul.f32 %v489_v39, %v2602_v30  ;;  %s2841_s29 = sld [smem:[#allocation2 + $0x45]] }
  0x44   : > { %v497_v53 = vrot.slane %v491_v45, 1 }
  0x47   : > { %293 = vrot.lane.b32.xlu1 %v288_v41, %s2489_s23  ;;  %291 = vrot.lane.b32.xlu0 %v287_v42, %s2489_s23  ;;  %v490_v41 = vmul.f32 %v489_v39, %v2591_v23  ;;  %v476_v42 = vrot.slane %v470_v34, 1 }
  0x49   : > { %305 = vrot.lane.b32.xlu2 %v301_v44, %s2489_s23  ;;  %v475_v44 = vrot.slane %v469_v36, 1  ;;  %v496_v47 = vrot.slane %v490_v41, 1  ;;  %v604_v41 = vrot.slane %v597_v32, 1  ;;  %v737_v32 = vmul.f32 %v734_v17, %v2641_v62 }
  0x4b   : > { %v498_v54 = vsel %vm377_vm0, %v496_v47, %v497_v53 }
  0x4f   : > { %319 = vrot.lane.b32.xlu1 %v315_v48, %s2490_s26  ;;  %307 = vrot.lane.b32.xlu0 %v302_v49, %s2489_s23  ;;  %v479_v48 = vsel %vm377_vm0, %v476_v42, %v478_v43  ;;  %v477_v49 = vsel %vm377_vm0, %v475_v44, %v476_v42  ;;  %v601_v42 = vrot.slane %v595_v33, 1  ;;  %v636_v44 = vstv %s2256_s25  ;;  %s2268_s25 = sld [smem:[#allocation2 + $0x44]] }
  0x51   : > { %321 = vrot.lane.b32.xlu2 %v316_v52, %s2490_s26  ;;  %v492_v52 = vmul.f32 %v489_v39, %v2641_v62 }
  0x53   : > { %v499_v58 = vrot.slane %v492_v52, 1 }
  0x57   : > { %335 = vrot.lane.b32.xlu1 %v330_v56, %s2490_s26  ;;  %333 = vrot.lane.b32.xlu0 %v329_v57, %s2490_s26  ;;  %v517_v56 = vrot.slane %v511_v50, 1  ;;  %v518_v57 = vrot.slane %v512_v51, 1  ;;  %v638_v50 = vmul.f32 %v636_v44, %v2593_v24 }
  0x59   : > { %347 = vrot.lane.b32.xlu2 %v343_v60, %s2491_s3  ;;  %v520_v60 = vrot.slane %v513_v55, 1 }
  0x5b   : > { %v521_v4 = vsel %vm377_vm0, %v518_v57, %v520_v60 }
  0x5f   : > { %361 = vrot.lane.b32.xlu1 %v357_v1, %s2491_s3  ;;  %349 = vrot.lane.b32.xlu0 %v344_v2, %s2491_s3  ;;  %v519_v1 = vsel %vm377_vm0, %v517_v56, %v518_v57  ;;  %v500_v2 = vsel %vm377_vm0, %v497_v53, %v499_v58  ;;  %v644_v56 = vrot.slane %v638_v50, 1  ;;  %v692_v58 = vstv %s2259_s27  ;;  %s2823_s27 = sld [smem:[#allocation2 + $0x38]] }
  0x60   : > { %v694_v63 = vmul.f32 %v692_v58, %v2602_v30 }
  0x61   : > { %363 = vrot.lane.b32.xlu2 %v358_v8, %s2491_s3  ;;  %v538_v8 = vrot.slane %v532_v0, 1  ;;  %v695_v0 = vmul.f32 %v692_v58, %v2641_v62 }
  0x63   : > { %v540_v14 = vsel %vm377_vm0, %v538_v8, %v539_v6  ;;  %v700_v8 = vrot.slane %v694_v63, 2  ;;  %v702_v9 = vrot.slane %v695_v0, 2  ;;  %v797_v0 = vstv %s2264_s14  ;;  %s2277_s14 = sld [smem:[#allocation2 + $0x18]] }
  0x67   : > { %419 = vrot.lane.b32.xlu1 %v416_v18, %s2487_s7  ;;  %417 = vrot.lane.b32.xlu0 %v414_v19, %s2487_s7  ;;  %v575_v18 = vmul.f32 %v573_v10, %v2602_v30  ;;  %v555_v19 = vmul.f32 %v552_v3, %v2653_v13 }
  0x69   : > { %438 = vrot.lane.b32.xlu2 %v435_v26, %s2487_s7  ;;  %v581_v26 = vrot.slane %v575_v18, 1  ;;  %v562_v27 = vrot.slane %v555_v19, 1  ;;  %v720_v18 = vrot.slane %v714_v7, 2  ;;  %v190_v19 = vstv %s2740_s30  ;;  %s2867_s30 = sld [smem:[#allocation2 + $0x16]] }
  0x6b   : > { %v582_v35 = vsel %vm377_vm0, %v580_v25, %v581_v26  ;;  %v563_v36 = vsel %vm377_vm0, %v560_v20, %v562_v27  ;;  %v196_v20 = vstv %s2742_s4  ;;  %v736_v27 = vmul.f32 %v734_v17, %v2602_v30  ;;  %s2274_s4 = sld [smem:[#allocation2 + $0x47]] }
  0x6c   : > { %v197_v33 = vmul.f32 %v196_v20, %v2585_v16 }
  0x6f   : > { %459 = vrot.lane.b32.xlu1 %v456_v37, %s2486_s6  ;;  %440 = vrot.lane.b32.xlu0 %v437_v38, %s2487_s7  ;;  %v615_v37 = vstv %s2255_s24  ;;  %v584_v38 = vsel %vm377_vm0, %v581_v26, %v583_v29  ;;  %v735_v26 = vmul.f32 %v734_v17, %v2591_v23  ;;  %v721_v29 = vrot.slane %v715_v11, 2  ;;  %s2243_s24 = sld [smem:[#allocation2 + $0x7]] }
  0x70   : > { %v616_v39 = vmul.f32 %v615_v37, %v2591_v23  ;;  %v617_v43 = vmul.f32 %v615_v37, %v2602_v30  ;;  %v618_v51 = vmul.f32 %v615_v37, %v2641_v62  ;;  %v742_v37 = vrot.slane %v736_v27, 2 }
  0x71   : > { %461 = vrot.lane.b32.xlu2 %v458_v40, %s2486_s6  ;;  %v602_v40 = vrot.slane %v596_v31, 1  ;;  %v722_v31 = vsel %vm664_vm1, %v720_v18, %v721_v29 }
  0x72   : > { %v622_v45 = vrot.slane %v616_v39, 1  ;;  %v623_v52 = vrot.slane %v617_v43, 1  ;;  %v625_v57 = vrot.slane %v618_v51, 1  ;;  %v755_v39 = vstv %s2262_s5  ;;  %s2275_s5 = sld [smem:[#allocation2 + $0x17]] }
  0x73   : > { %v605_v46 = vsel %vm377_vm0, %v602_v40, %v604_v41  ;;  %v603_v47 = vsel %vm377_vm0, %v601_v42, %v602_v40  ;;  %v192_v42 = vmul.f32 %v190_v19, %v2602_v30  ;;  %v198_v43 = vmul.f32 %v196_v20, %v2593_v24 }
  0x74   : > { %v624_v53 = vsel %vm377_vm0, %v622_v45, %v623_v52  ;;  %v757_v45 = vmul.f32 %v755_v39, %v2593_v24 }
  0x77   : > { %482 = vrot.lane.b32.xlu1 %v479_v48, %s2486_s6  ;;  %480 = vrot.lane.b32.xlu0 %v477_v49, %s2486_s6  ;;  %v637_v49 = vmul.f32 %v636_v44, %v2585_v16 }
  0x79   : > { %501 = vrot.lane.b32.xlu2 %v498_v54, %s2488_s17  ;;  %v639_v54 = vmul.f32 %v636_v44, %v2653_v13  ;;  %v643_v55 = vrot.slane %v637_v49, 1  ;;  %v744_v44 = vrot.slane %v737_v32, 2 }
  0x7b   : > { %v646_v61 = vrot.slane %v639_v54, 1  ;;  %v645_v3 = vsel %vm377_vm0, %v643_v55, %v644_v56  ;;  %v200_v54 = vadd.f32 %v198_v43, %v192_v42  ;;  %v745_v55 = vsel %vm664_vm1, %v742_v37, %v744_v44 }
  0x7d   : > { %v647_v6 = vsel %vm377_vm0, %v644_v56, %v646_v61 }
  0x7f   : > { %522 = vrot.lane.b32.xlu1 %v519_v1, %s2488_s17  ;;  %503 = vrot.lane.b32.xlu0 %v500_v2, %s2488_s17  ;;  %v693_v1 = vmul.f32 %v692_v58, %v2591_v23 }
  0x81   : > { %524 = vrot.lane.b32.xlu2 %v521_v4, %s2488_s17  ;;  %v626_v4 = vsel %vm377_vm0, %v623_v52, %v625_v57  ;;  %v699_v10 = vrot.slane %v693_v1, 2  ;;  %v763_v57 = vrot.slane %v757_v45, 2 }
  0x83   : > { %v2701_v15 = vpop.permute.xlu2 %235  ;;  %v701_v22 = vsel %vm664_vm1, %v699_v10, %v700_v8 }
  0x87   : > { %545 = vrot.lane.b32.xlu1 %v542_v12, %s2489_s23  ;;  %543 = vrot.lane.b32.xlu0 %v540_v14, %s2489_s23 }
  0x89   : > { %564 = vrot.lane.b32.xlu2 %v561_v21, %s2489_s23  ;;  %v703_v21 = vsel %vm664_vm1, %v700_v8, %v702_v9  ;;  %v798_v9 = vmul.f32 %v797_v0, %v2585_v16 }
  0x8b   : > { %v2714_v34 = vpop.permute.xlu2 %237 }
  0x8f   : > { %585 = vrot.lane.b32.xlu1 %v582_v35, %s2490_s26  ;;  %566 = vrot.lane.b32.xlu0 %v563_v36, %s2489_s23  ;;  %v191_v35 = vmul.f32 %v190_v19, %v2591_v23  ;;  %v741_v36 = vrot.slane %v735_v26, 2 }
  0x91   : > { %587 = vrot.lane.b32.xlu2 %v584_v38, %s2490_s26  ;;  %v723_v38 = vrot.slane %v716_v28, 2  ;;  %v199_v50 = vadd.f32 %v197_v33, %v191_v35  ;;  %v743_v51 = vsel %vm664_vm1, %v741_v36, %v742_v37  ;;  %v818_v28 = vstv %s2265_s16  ;;  %s2278_s16 = sld [smem:[#allocation2 + $0x49]] }
  0x92   : > { %v820_v33 = vmul.f32 %v818_v28, %v2602_v30  ;;  %v821_v35 = vmul.f32 %v818_v28, %v2641_v62 }
  0x93   : > { %v2726_v48 = vpop.permute.xlu2 %263  ;;  %v724_v52 = vsel %vm664_vm1, %v721_v29, %v723_v38 }
  0x94   : > { %v826_v44 = vrot.slane %v820_v33, 2 }
  0x97   : > { %608 = vrot.lane.b32.xlu1 %v605_v46, %s2490_s26  ;;  %606 = vrot.lane.b32.xlu0 %v603_v47, %s2490_s26  ;;  %v758_v46 = vmul.f32 %v755_v39, %v2653_v13  ;;  %v756_v47 = vmul.f32 %v755_v39, %v2585_v16  ;;  %v819_v39 = vmul.f32 %v818_v28, %v2591_v23 }
  0x99   : > { %v2735_v59 = vpop.permute.xlu0 %249  ;;  %v2737_v60 = vpop.permute.xlu1 %221  ;;  %627 = vrot.lane.b32.xlu2 %v624_v53, %s2491_s3  ;;  %v776_v53 = vstv %s2263_s8  ;;  %v765_v58 = vrot.slane %v758_v46, 2  ;;  %v762_v61 = vrot.slane %v756_v47, 2  ;;  %v825_v46 = vrot.slane %v819_v39, 2  ;;  %s2276_s8 = sld [smem:[#allocation2 + $0x48]] }
  0x9a   : > { %v777_v56 = vmul.f32 %v776_v53, %v2591_v23  ;;  %v778_v1 = vmul.f32 %v776_v53, %v2602_v30  ;;  %v779_v17 = vmul.f32 %v776_v53, %v2641_v62  ;;  %v860_v47 = vstv %s2267_s22  ;;  %s2280_s22 = sld [smem:[#allocation2 + $0x4a]] }
  0x9b   : > { %v2747_v2 = vpop.permute.xlu2 %279  ;;  %v766_v7 = vsel %vm664_vm1, %v763_v57, %v765_v58  ;;  %v764_v8 = vsel %vm664_vm1, %v762_v61, %v763_v57  ;;  %v827_v61 = vsel %vm664_vm1, %v825_v46, %v826_v44  ;;  %v902_v39 = vstv %s2833_s28  ;;  %s2258_s28 = sld [smem:[#allocation2 + $0x3f]] }
  0x9c   : > { %v784_v18 = vrot.slane %v778_v1, 2  ;;  %v786_v27 = vrot.slane %v779_v17, 2 }
  0x9e   : > { %v787_v38 = vsel %vm664_vm1, %v784_v18, %v786_v27 }
  0x9f   : > { %648 = vrot.lane.b32.xlu1 %v645_v3, %s2491_s3  ;;  %629 = vrot.lane.b32.xlu0 %v626_v4, %s2491_s3 }
  0xa1   : > { %v2756_v12 = vpop.permute.xlu1 %223  ;;  %v208_v14 = vpop.permute.xlu0 %207  ;;  %650 = vrot.lane.b32.xlu2 %v647_v6, %s2491_s3  ;;  %v783_v6 = vrot.slane %v777_v56, 2  ;;  %v861_v56 = vmul.f32 %v860_v47, %v2591_v23 }
  0xa2   : > { %v213_v63 = vadd.f32 %v208_v14, %v199_v50  ;;  %v799_v14 = vmul.f32 %v797_v0, %v2593_v24 }
  0xa3   : > { %v2763_v25 = vpop.permute.xlu2 %305  ;;  %v785_v20 = vsel %vm664_vm1, %v783_v6, %v784_v18  ;;  %v867_v6 = vrot.slane %v861_v56, 2 }
  0xa4   : > { %v227_v11 = vadd.f32 %v2737_v60, %v213_v63  ;;  %v805_v60 = vrot.slane %v799_v14, 2  ;;  %v881_v14 = vstv %s2268_s25  ;;  %s2257_s25 = sld [smem:[#allocation2 + $0xe]] }
  0xa5   : > { %v883_v27 = vmul.f32 %v881_v14, %v2593_v24  ;;  %v884_v28 = vmul.f32 %v881_v14, %v2653_v13 }
  0xa6   : > { %v241_v26 = vadd.f32 %v2701_v15, %v227_v11 }
  0xa7   : > { %706 = vrot.lane.b32.xlu1 %v703_v21, %s2487_s7  ;;  %704 = vrot.lane.b32.xlu0 %v701_v22, %s2487_s7  ;;  %v800_v21 = vmul.f32 %v797_v0, %v2653_v13  ;;  %v804_v22 = vrot.slane %v798_v9, 2 }
  0xa8   : > { %v255_v37 = vadd.f32 %v2735_v59, %v241_v26  ;;  %v828_v59 = vrot.slane %v821_v35, 2 }
  0xa9   : > { %v2774_v40 = vpop.permute.xlu1 %251  ;;  %v210_v41 = vpop.permute.xlu0 %209  ;;  %725 = vrot.lane.b32.xlu2 %v722_v31, %s2487_s7  ;;  %v807_v32 = vrot.slane %v800_v21, 2  ;;  %v806_v15 = vsel %vm664_vm1, %v804_v22, %v805_v60 }
  0xaa   : > { %v214_v5 = vadd.f32 %v210_v41, %v200_v54  ;;  %v839_v41 = vstv %s2266_s21  ;;  %v269_v45 = vadd.f32 %v2726_v48, %v255_v37  ;;  %v862_v48 = vmul.f32 %v860_v47, %v2602_v30  ;;  %s2279_s21 = sld [smem:[#allocation2 + $0x19]] }
  0xab   : > { %v2782_v49 = vpop.permute.xlu2 %321  ;;  %v840_v43 = vmul.f32 %v839_v41, %v2585_v16  ;;  %v841_v50 = vmul.f32 %v839_v41, %v2593_v24  ;;  %v842_v63 = vmul.f32 %v839_v41, %v2653_v13 }
  0xac   : > { %v228_v19 = vadd.f32 %v2756_v12, %v214_v5  ;;  %v863_v5 = vmul.f32 %v860_v47, %v2641_v62 }
  0xad   : > { %v846_v54 = vrot.slane %v840_v43, 2  ;;  %v847_v0 = vrot.slane %v841_v50, 2  ;;  %v849_v11 = vrot.slane %v842_v63, 2  ;;  %v903_v43 = vmul.f32 %v902_v39, %v2591_v23 }
  0xae   : > { %v242_v12 = vadd.f32 %v2714_v34, %v228_v19  ;;  %v808_v34 = vsel %vm664_vm1, %v805_v60, %v807_v32  ;;  %v870_v60 = vrot.slane %v863_v5, 2  ;;  %v923_v50 = vstv %s2841_s29  ;;  %s2964_s29 = sld [smem:[#allocation2 + $0x1b]] }
  0xaf   : > { %746 = vrot.lane.b32.xlu1 %v743_v51, %s2486_s6  ;;  %727 = vrot.lane.b32.xlu0 %v724_v52, %s2487_s7  ;;  %v850_v32 = vsel %vm664_vm1, %v847_v0, %v849_v11 }
  0xb0   : > { %v256_v42 = vadd.f32 %v2774_v40, %v242_v12 }
  0xb1   : > { %v278_v3 = vpop.permute.xlu1 %277  ;;  %v266_v4 = vpop.permute.xlu0 %265  ;;  %748 = vrot.lane.b32.xlu2 %v745_v55, %s2486_s6  ;;  %v829_v55 = vsel %vm664_vm1, %v826_v44, %v828_v59  ;;  %v889_v44 = vrot.slane %v883_v27, 2  ;;  %v891_v59 = vrot.slane %v884_v28, 2 }
  0xb2   : > { %v283_v52 = vadd.f32 %v278_v3, %v269_v45  ;;  %v270_v53 = vadd.f32 %v266_v4, %v256_v42  ;;  %v370_v3 = vstv %s2243_s24  ;;  %v848_v4 = vsel %vm664_vm1, %v846_v54, %v847_v0  ;;  %s2281_s24 = sld [smem:[#allocation2 + $0x1a]] }
  0xb3   : > { %v2795_v10 = vpop.permute.xlu2 %347  ;;  %v371_v18 = vmul.f32 %v370_v3, %v2591_v23  ;;  %v372_v19 = vmul.f32 %v370_v3, %v2602_v30  ;;  %v373_v26 = vmul.f32 %v370_v3, %v2641_v62  ;;  %v924_v0 = vmul.f32 %v923_v50, %v2585_v16 }
  0xb4   : > { %v284_v1 = vadd.f32 %v2747_v2, %v270_v53 }
  0xb5   : > { %v378_v37 = vrot.slane %v371_v18, 1  ;;  %v381_v42 = vrot.slane %v373_v26, 1 }
  0xb7   : > { %769 = vrot.lane.b32.xlu1 %v766_v7, %s2486_s6  ;;  %767 = vrot.lane.b32.xlu0 %v764_v8, %s2486_s6  ;;  %v868_v7 = vrot.slane %v862_v48, 2 }
  0xb9   : > { %v294_v29 = vpop.permute.xlu1 %293  ;;  %v292_v31 = vpop.permute.xlu0 %291  ;;  %788 = vrot.lane.b32.xlu2 %v785_v20, %s2488_s17  ;;  %v388_v20 = vstv %s2823_s27  ;;  %s2282_s27 = sld [smem:[#allocation2 + $0x4b]] }
  0xba   : > { %v297_v58 = vadd.f32 %v292_v31, %v283_v52  ;;  %v298_v8 = vadd.f32 %v294_v29, %v284_v1  ;;  %v882_v29 = vmul.f32 %v881_v14, %v2585_v16  ;;  %v389_v33 = vmul.f32 %v388_v20, %v2585_v16 }
  0xbb   : > { %v2810_v36 = vpop.permute.xlu2 %363  ;;  %v390_v35 = vmul.f32 %v388_v20, %v2593_v24  ;;  %v925_v1 = vmul.f32 %v923_v50, %v2593_v24 }
  0xbc   : > { %v311_v9 = vadd.f32 %v2763_v25, %v297_v58  ;;  %v869_v25 = vsel %vm664_vm1, %v867_v6, %v868_v7  ;;  %v888_v45 = vrot.slane %v882_v29, 2  ;;  %v905_v6 = vmul.f32 %v902_v39, %v2641_v62 }
  0xbd   : > { %v396_v52 = vrot.slane %v390_v35, 1 }
  0xbe   : > { %v890_v63 = vsel %vm664_vm1, %v888_v45, %v889_v44 }
  0xbf   : > { %809 = vrot.lane.b32.xlu1 %v806_v15, %s2488_s17  ;;  %790 = vrot.lane.b32.xlu0 %v787_v38, %s2488_s17  ;;  %v379_v15 = vrot.slane %v372_v19, 1  ;;  %v391_v38 = vmul.f32 %v388_v20, %v2653_v13  ;;  %v912_v20 = vrot.slane %v905_v6, 2 }
  0xc1   : > { %v320_v51 = vpop.permute.xlu1 %319  ;;  %v308_v40 = vpop.permute.xlu0 %307  ;;  %811 = vrot.lane.b32.xlu2 %v808_v34, %s2488_s17  ;;  %v871_v34 = vsel %vm664_vm1, %v868_v7, %v870_v60  ;;  %v382_v58 = vsel %vm377_vm0, %v379_v15, %v381_v42 }
  0xc2   : > { %v325_v21 = vadd.f32 %v320_v51, %v311_v9  ;;  %v312_v22 = vadd.f32 %v308_v40, %v298_v8  ;;  %v904_v51 = vmul.f32 %v902_v39, %v2602_v30  ;;  %v395_v40 = vrot.slane %v389_v33, 1 }
  0xc3   : > { %v2829_v57 = vpop.permute.xlu2 %438 }
  0xc4   : > { %v326_v41 = vadd.f32 %v2782_v49, %v312_v22  ;;  %v380_v49 = vsel %vm377_vm0, %v378_v37, %v379_v15  ;;  %v910_v7 = vrot.slane %v904_v51, 2  ;;  %v397_v8 = vsel %vm377_vm0, %v395_v40, %v396_v52 }
  0xc5   : > { %v1000_v15 = vstv %s2274_s4  ;;  %s2994_s4 = sld [smem:[#allocation2 + $0x1d]] }
  0xc6   : > { %v913_v37 = vsel %vm664_vm1, %v910_v7, %v912_v20  ;;  %v1001_v39 = vmul.f32 %v1000_v15, %v2585_v16 }
  0xc7   : > { %832 = vrot.lane.b32.xlu1 %v829_v55, %s2489_s23  ;;  %830 = vrot.lane.b32.xlu0 %v827_v61, %s2489_s23  ;;  %v398_v55 = vrot.slane %v391_v38, 1  ;;  %v909_v61 = vrot.slane %v903_v43, 2  ;;  %v1021_v43 = vstv %s2275_s5  ;;  %s2288_s5 = sld [smem:[#allocation2 + $0x4e]] }
  0xc9   : > { %v336_v2 = vpop.permute.xlu1 %335  ;;  %v334_v17 = vpop.permute.xlu0 %333  ;;  %851 = vrot.lane.b32.xlu2 %v848_v4, %s2489_s23  ;;  %v399_v9 = vsel %vm377_vm0, %v396_v52, %v398_v55  ;;  %v911_v14 = vsel %vm664_vm1, %v909_v61, %v910_v7 }
  0xca   : > { %v339_v12 = vadd.f32 %v334_v17, %v325_v21  ;;  %v340_v46 = vadd.f32 %v336_v2, %v326_v41  ;;  %v926_v2 = vmul.f32 %v923_v50, %v2653_v13  ;;  %v930_v17 = vrot.slane %v924_v0, 2 }
  0xcb   : > { %v2852_v31 = vpop.permute.xlu2 %461  ;;  %v979_v21 = vstv %s2867_s30  ;;  %s2970_s30 = sld [smem:[#allocation2 + $0x4c]] }
  0xcc   : > { %v353_v47 = vadd.f32 %v2795_v10, %v339_v12  ;;  %v892_v10 = vsel %vm664_vm1, %v889_v44, %v891_v59  ;;  %v933_v27 = vrot.slane %v926_v2, 2  ;;  %v981_v28 = vmul.f32 %v979_v21, %v2602_v30 }
  0xcd   : > { %v982_v29 = vmul.f32 %v979_v21, %v2641_v62  ;;  %v980_v12 = vmul.f32 %v979_v21, %v2591_v23 }
  0xce   : > { %v987_v41 = vrot.slane %v981_v28, 3 }
  0xcf   : > { %872 = vrot.lane.b32.xlu1 %v869_v25, %s2490_s26  ;;  %853 = vrot.lane.b32.xlu0 %v850_v32, %s2489_s23  ;;  %v989_v42 = vrot.slane %v982_v29, 3 }
  0xd1   : > { %v362_v53 = vpop.permute.xlu1 %361  ;;  %v350_v54 = vpop.permute.xlu0 %349  ;;  %874 = vrot.lane.b32.xlu2 %v871_v34, %s2490_s26  ;;  %v986_v34 = vrot.slane %v980_v12, 3  ;;  %v990_v50 = vsel %vm951_vm2, %v987_v41, %v989_v42 }
  0xd2   : > { %v367_v56 = vadd.f32 %v362_v53, %v353_v47  ;;  %v354_v48 = vadd.f32 %v350_v54, %v340_v46  ;;  %v1007_v47 = vrot.slane %v1001_v39, 3  ;;  %v1023_v53 = vmul.f32 %v1021_v43, %v2602_v30 }
  0xd3   : > { %v2876_v3 = vpop.permute.xlu2 %501  ;;  %v988_v51 = vsel %vm951_vm2, %v986_v34, %v987_v41  ;;  %v1003_v54 = vmul.f32 %v1000_v15, %v2653_v13 }
  0xd4   : > { %v385_v4 = vadd.f32 %v380_v49, %v367_v56  ;;  %v368_v5 = vadd.f32 %v2810_v36, %v354_v48  ;;  %v931_v36 = vrot.slane %v925_v1, 2  ;;  %v1022_v49 = vmul.f32 %v1021_v43, %v2591_v23 }
  0xd5   : > { %v1024_v48 = vmul.f32 %v1021_v43, %v2641_v62  ;;  %v1029_v61 = vrot.slane %v1023_v53, 3 }
  0xd6   : > { %v386_v11 = vadd.f32 %v382_v58, %v368_v5  ;;  %v402_v18 = vadd.f32 %v397_v8, %v385_v4  ;;  %v932_v35 = vsel %vm664_vm1, %v930_v17, %v931_v36  ;;  %v934_v38 = vsel %vm664_vm1, %v931_v36, %v933_v27 }
  0xd7   : > { %895 = vrot.lane.b32.xlu1 %v892_v10, %s2490_s26  ;;  %893 = vrot.lane.b32.xlu0 %v890_v63, %s2490_s26  ;;  %v1028_v58 = vrot.slane %v1022_v49, 3  ;;  %v1010_v10 = vrot.slane %v1003_v54, 3  ;;  %v1042_v63 = vstv %s2276_s8  ;;  %v1031_v5 = vrot.slane %v1024_v48, 3  ;;  %s2289_s8 = sld [smem:[#allocation2 + $0x1e]] }
  0xd8   : > { %v403_v19 = vadd.f32 %v399_v9, %v386_v11  ;;  %v1044_v6 = vmul.f32 %v1042_v63, %v2593_v24  ;;  %v1045_v7 = vmul.f32 %v1042_v63, %v2653_v13  ;;  %v1043_v8 = vmul.f32 %v1042_v63, %v2585_v16 }
  0xd9   : > { %v420_v22 = vpop.permute.xlu1 %419  ;;  %v418_v26 = vpop.permute.xlu0 %417  ;;  %914 = vrot.lane.b32.xlu2 %v911_v14, %s2491_s3  ;;  %v1030_v14 = vsel %vm951_vm2, %v1028_v58, %v1029_v61  ;;  %v1063_v17 = vstv %s2277_s14  ;;  %v1032_v36 = vsel %vm951_vm2, %v1029_v61, %v1031_v5  ;;  %s2290_s14 = sld [smem:[#allocation2 + $0x4f]] }
  0xda   : > { %v424_v60 = vadd.f32 %v420_v22, %v403_v19  ;;  %v423_v25 = vadd.f32 %v418_v26, %v402_v18  ;;  %v1064_v18 = vmul.f32 %v1063_v17, %v2591_v23  ;;  %v1050_v19 = vrot.slane %v1044_v6, 3 }
  0xdb   : > { %v2891_v32 = vpop.permute.xlu2 %524  ;;  %v1052_v20 = vrot.slane %v1045_v7, 3  ;;  %v1049_v21 = vrot.slane %v1043_v8, 3  ;;  %v1084_v22 = vstv %s2278_s16  ;;  %v1065_v26 = vmul.f32 %v1063_v17, %v2602_v30  ;;  %s2291_s16 = sld [smem:[#allocation2 + $0x1f]] }
  0xdc   : > { %v444_v33 = vadd.f32 %v2829_v57, %v423_v25  ;;  %v1002_v57 = vmul.f32 %v1000_v15, %v2593_v24  ;;  %v1070_v28 = vrot.slane %v1064_v18, 3  ;;  %v1086_v15 = vmul.f32 %v1084_v22, %v2593_v24 }
  0xdd   : > { %v1053_v29 = vsel %vm951_vm2, %v1050_v19, %v1052_v20  ;;  %v1051_v12 = vsel %vm951_vm2, %v1049_v21, %v1050_v19  ;;  %v1071_v39 = vrot.slane %v1065_v26, 3  ;;  %v1087_v42 = vmul.f32 %v1084_v22, %v2653_v13 }
  0xde   : > { %v1008_v55 = vrot.slane %v1002_v57, 3  ;;  %v1092_v43 = vrot.slane %v1086_v15, 3  ;;  %v657_v19 = vstv %s2257_s25  ;;  %s2295_s25 = sld [smem:[#allocation2 + $0x21]] }
  0xdf   : > { %935 = vrot.lane.b32.xlu1 %v932_v35, %s2491_s3  ;;  %916 = vrot.lane.b32.xlu0 %v913_v37, %s2491_s3  ;;  %v1072_v41 = vsel %vm951_vm2, %v1070_v28, %v1071_v39  ;;  %v659_v28 = vmul.f32 %v657_v19, %v2602_v30 }
  0xe0   : > { %v1009_v56 = vsel %vm951_vm2, %v1007_v47, %v1008_v55  ;;  %v1011_v2 = vsel %vm951_vm2, %v1008_v55, %v1010_v10  ;;  %v1094_v47 = vrot.slane %v1087_v42, 3 }
  0xe1   : > { %v460_v44 = vpop.permute.xlu1 %459  ;;  %v441_v59 = vpop.permute.xlu0 %440  ;;  %937 = vrot.lane.b32.xlu2 %v934_v38, %s2491_s3  ;;  %v1066_v38 = vmul.f32 %v1063_v17, %v2641_v62 }
  0xe2   : > { %v465_v45 = vadd.f32 %v460_v44, %v444_v33  ;;  %v445_v46 = vadd.f32 %v441_v59, %v424_v60  ;;  %v1085_v33 = vmul.f32 %v1084_v22, %v2585_v16  ;;  %v1105_v44 = vstv %s2279_s21  ;;  %s2292_s21 = sld [smem:[#allocation2 + $0x50]] }
  0xe3   : > { %v2905_v40 = vpop.permute.xlu2 %564  ;;  %v1073_v57 = vrot.slane %v1066_v38, 3  ;;  %v1106_v55 = vmul.f32 %v1105_v44, %v2591_v23  ;;  %v1095_v48 = vsel %vm951_vm2, %v1092_v43, %v1094_v47  ;;  %v1189_v47 = vstv %s2964_s29  ;;  %s2272_s29 = sld [smem:[#allocation2 + $0x46]] }
  0xe4   : > { %v466_v52 = vadd.f32 %v2852_v31, %v445_v46  ;;  %v1091_v34 = vrot.slane %v1085_v33, 3 }
  0xe5   : > { %v1074_v54 = vsel %vm951_vm2, %v1071_v39, %v1073_v57  ;;  %v1112_v63 = vrot.slane %v1106_v55, 3  ;;  %v1210_v55 = vstv %s2970_s30  ;;  %s3091_s30 = sld [smem:[#allocation2 + $0x22]] }
  0xe6   : > { %v1093_v53 = vsel %vm951_vm2, %v1091_v34, %v1092_v43 }
  0xe7   : > { %993 = vrot.lane.b32.xlu1 %v990_v50, %s2487_s7  ;;  %991 = vrot.lane.b32.xlu0 %v988_v51, %s2487_s7  ;;  %v1107_v50 = vmul.f32 %v1105_v44, %v2602_v30  ;;  %v1108_v51 = vmul.f32 %v1105_v44, %v2641_v62 }
  0xe9   : > { %v483_v31 = vpop.permute.xlu1 %482  ;;  %v481_v0 = vpop.permute.xlu0 %480  ;;  %1012 = vrot.lane.b32.xlu2 %v1009_v56, %s2487_s7  ;;  %v1126_v56 = vstv %s2280_s22  ;;  %v1113_v61 = vrot.slane %v1107_v50, 3  ;;  %v1115_v10 = vrot.slane %v1108_v51, 3  ;;  %s2293_s22 = sld [smem:[#allocation2 + $0x20]] }
  0xea   : > { %v487_v1 = vadd.f32 %v483_v31, %v466_v52  ;;  %v486_v4 = vadd.f32 %v481_v0, %v465_v45  ;;  %v1127_v58 = vmul.f32 %v1126_v56, %v2585_v16  ;;  %v1128_v31 = vmul.f32 %v1126_v56, %v2593_v24 }
  0xeb   : > { %v2918_v9 = vpop.permute.xlu2 %587  ;;  %v1116_v7 = vsel %vm951_vm2, %v1113_v61, %v1115_v10  ;;  %v1114_v17 = vsel %vm951_vm2, %v1112_v63, %v1113_v61 }
  0xec   : > { %v507_v11 = vadd.f32 %v2876_v3, %v486_v4  ;;  %v1133_v6 = vrot.slane %v1127_v58, 3  ;;  %v1134_v18 = vrot.slane %v1128_v31, 3 }
  0xee   : > { %v1135_v20 = vsel %vm951_vm2, %v1133_v6, %v1134_v18 }
  0xef   : > { %1033 = vrot.lane.b32.xlu1 %v1030_v14, %s2486_s6  ;;  %1014 = vrot.lane.b32.xlu0 %v1011_v2, %s2487_s7 }
  0xf1   : > { %v523_v3 = vpop.permute.xlu1 %522  ;;  %v504_v60 = vpop.permute.xlu0 %503  ;;  %1035 = vrot.lane.b32.xlu2 %v1032_v36, %s2486_s6  ;;  %v1129_v36 = vmul.f32 %v1126_v56, %v2653_v13  ;;  %v1191_v56 = vmul.f32 %v1189_v47, %v2602_v30 }
  0xf2   : > { %v528_v25 = vadd.f32 %v523_v3, %v507_v11  ;;  %v508_v27 = vadd.f32 %v504_v60, %v487_v1 }
  0xf3   : > { %v2932_v35 = vpop.permute.xlu2 %627  ;;  %v1136_v3 = vrot.slane %v1129_v36, 3  ;;  %v1192_v36 = vmul.f32 %v1189_v47, %v2641_v62 }
  0xf4   : > { %v529_v37 = vadd.f32 %v2891_v32, %v508_v27  ;;  %v658_v27 = vmul.f32 %v657_v19, %v2591_v23 }
  0xf5   : > { %v1137_v57 = vsel %vm951_vm2, %v1134_v18, %v1136_v3  ;;  %v1197_v18 = vrot.slane %v1191_v56, 3 }
  0xf7   : > { %1056 = vrot.lane.b32.xlu1 %v1053_v29, %s2486_s6  ;;  %1054 = vrot.lane.b32.xlu0 %v1051_v12, %s2486_s6  ;;  %v675_v29 = vstv %s2258_s28  ;;  %s2296_s28 = sld [smem:[#allocation2 + $0x52]] }
  0xf8   : > { %v676_v44 = vmul.f32 %v675_v29, %v2585_v16 }
  0xf9   : > { %v546_v32 = vpop.permute.xlu1 %545  ;;  %v544_v59 = vpop.permute.xlu0 %543  ;;  %1075 = vrot.lane.b32.xlu2 %v1072_v41, %s2488_s17 }
  0xfa   : > { %v550_v45 = vadd.f32 %v546_v32, %v529_v37  ;;  %v549_v46 = vadd.f32 %v544_v59, %v528_v25  ;;  %v660_v37 = vmul.f32 %v657_v19, %v2641_v62  ;;  %v677_v32 = vmul.f32 %v675_v29, %v2593_v24 }
  0xfb   : > { %v2944_v49 = vpop.permute.xlu2 %650  ;;  %v665_v59 = vrot.slane %v658_v27, 2  ;;  %v682_v58 = vrot.slane %v676_v44, 2  ;;  %v1266_v27 = vstv %s2994_s4  ;;  %v1287_v44 = vstv %s2288_s5  ;;  %s3097_s4 = sld [smem:[#allocation2 + $0x53]] }
  0xfc   : > { %v570_v52 = vadd.f32 %v2905_v40, %v549_v46  ;;  %v1147_v40 = vstv %s2281_s24  ;;  %v678_v46 = vmul.f32 %v675_v29, %v2653_v13  ;;  %v668_v50 = vrot.slane %v660_v37, 2  ;;  %s2294_s24 = sld [smem:[#allocation2 + $0x51]] }
  0xfd   : > { %v1148_v8 = vmul.f32 %v1147_v40, %v2591_v23  ;;  %v1149_v11 = vmul.f32 %v1147_v40, %v2602_v30  ;;  %v1150_v21 = vmul.f32 %v1147_v40, %v2641_v62  ;;  %v683_v61 = vrot.slane %v677_v32, 2  ;;  %s3121_s5 = sld [smem:[#allocation2 + $0x24]] }
  0xfe   : > { %v685_v40 = vrot.slane %v678_v46, 2 }
  0xff   : > { %1096 = vrot.lane.b32.xlu1 %v1093_v53, %s2488_s17  ;;  %1077 = vrot.lane.b32.xlu0 %v1074_v54, %s2488_s17  ;;  %v1154_v22 = vrot.slane %v1148_v8, 3  ;;  %v1155_v26 = vrot.slane %v1149_v11, 3  ;;  %v1157_v15 = vrot.slane %v1150_v21, 3  ;;  %v1212_v8 = vmul.f32 %v1210_v55, %v2593_v24 }
 0x100   : > { %v684_v19 = vsel %vm664_vm1, %v682_v58, %v683_v61 }
 0x101   : > { %v586_v0 = vpop.permute.xlu1 %585  ;;  %v567_v1 = vpop.permute.xlu0 %566  ;;  %1098 = vrot.lane.b32.xlu2 %v1095_v48, %s2488_s17  ;;  %v1156_v38 = vsel %vm951_vm2, %v1154_v22, %v1155_v26  ;;  %v1158_v51 = vsel %vm951_vm2, %v1155_v26, %v1157_v15  ;;  %v1213_v26 = vmul.f32 %v1210_v55, %v2653_v13  ;;  %v1268_v15 = vmul.f32 %v1266_v27, %v2602_v30 }
 0x102   : > { %v591_v4 = vadd.f32 %v586_v0, %v570_v52  ;;  %v571_v5 = vadd.f32 %v567_v1, %v550_v45  ;;  %v666_v45 = vrot.slane %v659_v28, 2  ;;  %v1190_v52 = vmul.f32 %v1189_v47, %v2591_v23 }
 0x103   : > { %v2959_v14 = vpop.permute.xlu2 %725  ;;  %v1220_v37 = vrot.slane %v1213_v26, 3 }
 0x104   : > { %v592_v2 = vadd.f32 %v2918_v9, %v571_v5  ;;  %v1168_v9 = vstv %s2282_s27  ;;  %v667_v48 = vsel %vm664_vm1, %v665_v59, %v666_v45  ;;  %v669_v1 = vsel %vm664_vm1, %v666_v45, %v668_v50  ;;  %s2271_s27 = sld [smem:[#allocation2 + $0x15]] }
 0x105   : > { %v1170_v39 = vmul.f32 %v1168_v9, %v2593_v24  ;;  %v1171_v41 = vmul.f32 %v1168_v9, %v2653_v13  ;;  %v1169_v42 = vmul.f32 %v1168_v9, %v2585_v16  ;;  %v1288_v59 = vmul.f32 %v1287_v44, %v2585_v16 }
 0x106   : > { %v1274_v45 = vrot.slane %v1268_v15, 4  ;;  %v1308_v50 = vstv %s2289_s8  ;;  %s2302_s8 = sld [smem:[#allocation2 + $0x55]] }
 0x107   : > { %1119 = vrot.lane.b32.xlu1 %v1116_v7, %s2489_s23  ;;  %1117 = vrot.lane.b32.xlu0 %v1114_v17, %s2489_s23  ;;  %v1178_v53 = vrot.slane %v1171_v41, 3  ;;  %v1175_v54 = vrot.slane %v1169_v42, 3  ;;  %v1211_v7 = vmul.f32 %v1210_v55, %v2585_v16 }
 0x109   : > { %v609_v60 = vpop.permute.xlu1 %608  ;;  %v607_v25 = vpop.permute.xlu0 %606  ;;  %1138 = vrot.lane.b32.xlu2 %v1135_v20, %s2489_s23  ;;  %v686_v20 = vsel %vm664_vm1, %v683_v61, %v685_v40  ;;  %v1217_v3 = vrot.slane %v1211_v7, 3 }
 0x10a   : > { %v613_v12 = vadd.f32 %v609_v60, %v592_v2  ;;  %v612_v33 = vadd.f32 %v607_v25, %v591_v4  ;;  %v1196_v4 = vrot.slane %v1190_v52, 3  ;;  %v1199_v25 = vrot.slane %v1192_v36, 3 }
 0x10b   : > { %v2980_v34 = vpop.permute.xlu2 %748 }
 0x10c   : > { %v633_v43 = vadd.f32 %v2932_v35, %v612_v33  ;;  %v1176_v35 = vrot.slane %v1170_v39, 3  ;;  %v1198_v22 = vsel %vm951_vm2, %v1196_v4, %v1197_v18  ;;  %v1267_v39 = vmul.f32 %v1266_v27, %v2591_v23 }
 0x10e   : > { %v1179_v5 = vsel %vm951_vm2, %v1176_v35, %v1178_v53  ;;  %v1177_v6 = vsel %vm951_vm2, %v1175_v54, %v1176_v35  ;;  %v1273_v47 = vrot.slane %v1267_v39, 4  ;;  %v1294_v54 = vrot.slane %v1288_v59, 4 }
 0x10f   : > { %1159 = vrot.lane.b32.xlu1 %v1156_v38, %s2490_s26  ;;  %1140 = vrot.lane.b32.xlu0 %v1137_v57, %s2489_s23  ;;  %v1269_v38 = vmul.f32 %v1266_v27, %v2641_v62  ;;  %v1200_v57 = vsel %vm951_vm2, %v1197_v18, %v1199_v25 }
 0x110   : > { %v1275_v56 = vsel %vm1238_vm3, %v1273_v47, %v1274_v45 }
 0x111   : > { %v649_v10 = vpop.permute.xlu1 %648  ;;  %v630_v63 = vpop.permute.xlu0 %629  ;;  %1161 = vrot.lane.b32.xlu2 %v1158_v51, %s2490_s26  ;;  %v1276_v46 = vrot.slane %v1269_v38, 4 }
 0x112   : > { %v654_v31 = vadd.f32 %v649_v10, %v633_v43  ;;  %v634_v0 = vadd.f32 %v630_v63, %v613_v12  ;;  %v1310_v10 = vmul.f32 %v1308_v50, %v2602_v30  ;;  %v1290_v63 = vmul.f32 %v1287_v44, %v2653_v13 }
 0x113   : > { %v3003_v11 = vpop.permute.xlu2 %788  ;;  %v1277_v55 = vsel %vm1238_vm3, %v1274_v45, %v1276_v46 }
 0x114   : > { %v672_v2 = vadd.f32 %v667_v48, %v654_v31  ;;  %v655_v17 = vadd.f32 %v2944_v49, %v634_v0  ;;  %v1218_v49 = vrot.slane %v1212_v8, 3  ;;  %v1309_v48 = vmul.f32 %v1308_v50, %v2591_v23 }
 0x115   : > { %v1311_v0 = vmul.f32 %v1308_v50, %v2641_v62  ;;  %v1316_v4 = vrot.slane %v1310_v10, 4 }
 0x116   : > { %v673_v21 = vadd.f32 %v669_v1, %v655_v17  ;;  %v689_v9 = vadd.f32 %v684_v19, %v672_v2  ;;  %v1219_v43 = vsel %vm951_vm2, %v1217_v3, %v1218_v49  ;;  %v1221_v32 = vsel %vm951_vm2, %v1218_v49, %v1220_v37 }
 0x117   : > { %1182 = vrot.lane.b32.xlu1 %v1179_v5, %s2490_s26  ;;  %1180 = vrot.lane.b32.xlu0 %v1177_v6, %s2490_s26  ;;  %v1315_v1 = vrot.slane %v1309_v48, 4  ;;  %v1297_v5 = vrot.slane %v1290_v63, 4  ;;  %v1329_v6 = vstv %s2290_s14  ;;  %v1318_v17 = vrot.slane %v1311_v0, 4  ;;  %s2303_s14 = sld [smem:[#allocation2 + $0x25]] }
 0x118   : > { %v690_v60 = vadd.f32 %v686_v20, %v673_v21  ;;  %v1331_v36 = vmul.f32 %v1329_v6, %v2593_v24  ;;  %v1332_v18 = vmul.f32 %v1329_v6, %v2653_v13  ;;  %v1330_v19 = vmul.f32 %v1329_v6, %v2585_v16 }
 0x119   : > { %v707_v28 = vpop.permute.xlu1 %706  ;;  %v705_v29 = vpop.permute.xlu0 %704  ;;  %1201 = vrot.lane.b32.xlu2 %v1198_v22, %s2491_s3  ;;  %v1317_v22 = vsel %vm1238_vm3, %v1315_v1, %v1316_v4  ;;  %v1350_v3 = vstv %s2291_s16  ;;  %v1319_v49 = vsel %vm1238_vm3, %v1316_v4, %v1318_v17  ;;  %s2304_s16 = sld [smem:[#allocation2 + $0x56]] }
 0x11a   : > { %v711_v12 = vadd.f32 %v707_v28, %v690_v60  ;;  %v710_v33 = vadd.f32 %v705_v29, %v689_v9  ;;  %v1351_v9 = vmul.f32 %v1350_v3, %v2591_v23  ;;  %v1337_v60 = vrot.slane %v1331_v36, 4 }
 0x11b   : > { %v3018_v41 = vpop.permute.xlu2 %811  ;;  %v1339_v25 = vrot.slane %v1332_v18, 4  ;;  %v1336_v27 = vrot.slane %v1330_v19, 4  ;;  %v1371_v28 = vstv %s2292_s21  ;;  %v1352_v29 = vmul.f32 %v1350_v3, %v2602_v30  ;;  %s2305_s21 = sld [smem:[#allocation2 + $0x26]] }
 0x11c   : > { %v731_v42 = vadd.f32 %v2959_v14, %v710_v33  ;;  %v1289_v14 = vmul.f32 %v1287_v44, %v2593_v24  ;;  %v1357_v15 = vrot.slane %v1351_v9, 4  ;;  %v1373_v44 = vmul.f32 %v1371_v28, %v2593_v24 }
 0x11d   : > { %v1340_v38 = vsel %vm1238_vm3, %v1337_v60, %v1339_v25  ;;  %v1338_v39 = vsel %vm1238_vm3, %v1336_v27, %v1337_v60  ;;  %v1358_v59 = vrot.slane %v1352_v29, 4  ;;  %v1374_v46 = vmul.f32 %v1371_v28, %v2653_v13 }
 0x11e   : > { %v1295_v40 = vrot.slane %v1289_v14, 4  ;;  %v1379_v50 = vrot.slane %v1373_v44, 4  ;;  %v944_v60 = vstv %s2271_s27  ;;  %s2309_s27 = sld [smem:[#allocation2 + $0x28]] }
 0x11f   : > { %1222 = vrot.lane.b32.xlu1 %v1219_v43, %s2491_s3  ;;  %1203 = vrot.lane.b32.xlu0 %v1200_v57, %s2491_s3  ;;  %v1359_v45 = vsel %vm1238_vm3, %v1357_v15, %v1358_v59  ;;  %v946_v15 = vmul.f32 %v944_v60, %v2602_v30 }
 0x120   : > { %v1296_v31 = vsel %vm1238_vm3, %v1294_v54, %v1295_v40  ;;  %v1298_v26 = vsel %vm1238_vm3, %v1295_v40, %v1297_v5  ;;  %v1381_v54 = vrot.slane %v1374_v46, 4 }
 0x121   : > { %v747_v51 = vpop.permute.xlu1 %746  ;;  %v728_v52 = vpop.permute.xlu0 %727  ;;  %1224 = vrot.lane.b32.xlu2 %v1221_v32, %s2491_s3  ;;  %v1353_v32 = vmul.f32 %v1350_v3, %v2641_v62 }
 0x122   : > { %v752_v35 = vadd.f32 %v747_v51, %v731_v42  ;;  %v732_v53 = vadd.f32 %v728_v52, %v711_v12  ;;  %v1372_v42 = vmul.f32 %v1371_v28, %v2585_v16  ;;  %v1392_v51 = vstv %s2293_s22  ;;  %s2306_s22 = sld [smem:[#allocation2 + $0x57]] }
 0x123   : > { %v3032_v58 = vpop.permute.xlu2 %851  ;;  %v1360_v14 = vrot.slane %v1353_v32, 4  ;;  %v1393_v40 = vmul.f32 %v1392_v51, %v2591_v23  ;;  %v1382_v0 = vsel %vm1238_vm3, %v1379_v50, %v1381_v54  ;;  %v1476_v54 = vstv %s3091_s30  ;;  %s2286_s30 = sld [smem:[#allocation2 + $0x4d]] }
 0x124   : > { %v753_v61 = vadd.f32 %v2980_v34, %v732_v53  ;;  %v1378_v47 = vrot.slane %v1372_v42, 4 }
 0x125   : > { %v1361_v63 = vsel %vm1238_vm3, %v1358_v59, %v1360_v14  ;;  %v1399_v6 = vrot.slane %v1393_v40, 4  ;;  %v1497_v40 = vstv %s3097_s4  ;;  %s3218_s4 = sld [smem:[#allocation2 + $0x29]] }
 0x126   : > { %v1380_v10 = vsel %vm1238_vm3, %v1378_v47, %v1379_v50 }
 0x127   : > { %1280 = vrot.lane.b32.xlu1 %v1277_v55, %s2487_s7  ;;  %1278 = vrot.lane.b32.xlu0 %v1275_v56, %s2487_s7  ;;  %v1394_v55 = vmul.f32 %v1392_v51, %v2602_v30  ;;  %v1395_v56 = vmul.f32 %v1392_v51, %v2641_v62 }
 0x129   : > { %v770_v34 = vpop.permute.xlu1 %769  ;;  %v768_v7 = vpop.permute.xlu0 %767  ;;  %1299 = vrot.lane.b32.xlu2 %v1296_v31, %s2487_s7  ;;  %v1413_v31 = vstv %s2294_s24  ;;  %v1400_v4 = vrot.slane %v1394_v55, 4  ;;  %v1402_v5 = vrot.slane %v1395_v56, 4  ;;  %s2307_s24 = sld [smem:[#allocation2 + $0x27]] }
 0x12a   : > { %v774_v8 = vadd.f32 %v770_v34, %v753_v61  ;;  %v773_v2 = vadd.f32 %v768_v7, %v752_v35  ;;  %v1414_v1 = vmul.f32 %v1413_v31, %v2585_v16  ;;  %v1415_v34 = vmul.f32 %v1413_v31, %v2593_v24 }
 0x12b   : > { %v3045_v20 = vpop.permute.xlu2 %874  ;;  %v1403_v18 = vsel %vm1238_vm3, %v1400_v4, %v1402_v5  ;;  %v1401_v3 = vsel %vm1238_vm3, %v1399_v6, %v1400_v4 }
 0x12c   : > { %v794_v21 = vadd.f32 %v3003_v11, %v773_v2  ;;  %v1420_v36 = vrot.slane %v1414_v1, 4  ;;  %v1421_v9 = vrot.slane %v1415_v34, 4 }
 0x12e   : > { %v1422_v25 = vsel %vm1238_vm3, %v1420_v36, %v1421_v9 }
 0x12f   : > { %1320 = vrot.lane.b32.xlu1 %v1317_v22, %s2486_s6  ;;  %1301 = vrot.lane.b32.xlu0 %v1298_v26, %s2487_s7 }
 0x131   : > { %v810_v11 = vpop.permute.xlu1 %809  ;;  %v791_v12 = vpop.permute.xlu0 %790  ;;  %1322 = vrot.lane.b32.xlu2 %v1319_v49, %s2486_s6  ;;  %v1416_v49 = vmul.f32 %v1413_v31, %v2653_v13  ;;  %v1478_v31 = vmul.f32 %v1476_v54, %v2602_v30 }
 0x132   : > { %v815_v33 = vadd.f32 %v810_v11, %v794_v21  ;;  %v795_v37 = vadd.f32 %v791_v12, %v774_v8 }
 0x133   : > { %v3059_v43 = vpop.permute.xlu2 %914  ;;  %v1423_v11 = vrot.slane %v1416_v49, 4  ;;  %v1479_v49 = vmul.f32 %v1476_v54, %v2641_v62 }
 0x134   : > { %v816_v57 = vadd.f32 %v3018_v41, %v795_v37  ;;  %v945_v37 = vmul.f32 %v944_v60, %v2591_v23 }
 0x135   : > { %v1424_v14 = vsel %vm1238_vm3, %v1421_v9, %v1423_v11  ;;  %v1484_v9 = vrot.slane %v1478_v31, 4 }
 0x137   : > { %1343 = vrot.lane.b32.xlu1 %v1340_v38, %s2486_s6  ;;  %1341 = vrot.lane.b32.xlu0 %v1338_v39, %s2486_s6  ;;  %v962_v38 = vstv %s2272_s29  ;;  %s2310_s29 = sld [smem:[#allocation2 + $0x59]] }
 0x138   : > { %v963_v51 = vmul.f32 %v962_v38, %v2585_v16 }
 0x139   : > { %v833_v41 = vpop.permute.xlu1 %832  ;;  %v831_v52 = vpop.permute.xlu0 %830  ;;  %1362 = vrot.lane.b32.xlu2 %v1359_v45, %s2488_s17 }
 0x13a   : > { %v837_v35 = vadd.f32 %v833_v41, %v816_v57  ;;  %v836_v53 = vadd.f32 %v831_v52, %v815_v33  ;;  %v947_v57 = vmul.f32 %v944_v60, %v2641_v62  ;;  %v964_v41 = vmul.f32 %v962_v38, %v2593_v24 }
 0x13b   : > { %v3071_v48 = vpop.permute.xlu2 %937  ;;  %v952_v52 = vrot.slane %v945_v37, 3  ;;  %v969_v1 = vrot.slane %v963_v51, 3  ;;  %v1553_v37 = vstv %s3121_s5  ;;  %v1574_v51 = vstv %s2302_s8  ;;  %s3224_s5 = sld [smem:[#allocation2 + $0x5a]] }
 0x13c   : > { %v857_v61 = vadd.f32 %v3032_v58, %v836_v53  ;;  %v1434_v58 = vstv %s2295_s25  ;;  %v965_v53 = vmul.f32 %v962_v38, %v2653_v13  ;;  %v955_v55 = vrot.slane %v947_v57, 3  ;;  %s2308_s25 = sld [smem:[#allocation2 + $0x58]] }
 0x13d   : > { %v1435_v19 = vmul.f32 %v1434_v58, %v2591_v23  ;;  %v1436_v21 = vmul.f32 %v1434_v58, %v2602_v30  ;;  %v1437_v27 = vmul.f32 %v1434_v58, %v2641_v62  ;;  %v970_v4 = vrot.slane %v964_v41, 3  ;;  %s3248_s8 = sld [smem:[#allocation2 + $0x2b]] }
 0x13e   : > { %v972_v58 = vrot.slane %v965_v53, 3 }
 0x13f   : > { %1383 = vrot.lane.b32.xlu1 %v1380_v10, %s2488_s17  ;;  %1364 = vrot.lane.b32.xlu0 %v1361_v63, %s2488_s17  ;;  %v1441_v28 = vrot.slane %v1435_v19, 4  ;;  %v1442_v29 = vrot.slane %v1436_v21, 4  ;;  %v1444_v44 = vrot.slane %v1437_v27, 4  ;;  %v1499_v19 = vmul.f32 %v1497_v40, %v2593_v24 }
 0x140   : > { %v971_v60 = vsel %vm951_vm2, %v969_v1, %v970_v4 }
 0x141   : > { %v873_v7 = vpop.permute.xlu1 %872  ;;  %v854_v8 = vpop.permute.xlu0 %853  ;;  %1385 = vrot.lane.b32.xlu2 %v1382_v0, %s2488_s17  ;;  %v1443_v32 = vsel %vm1238_vm3, %v1441_v28, %v1442_v29  ;;  %v1445_v56 = vsel %vm1238_vm3, %v1442_v29, %v1444_v44  ;;  %v1500_v29 = vmul.f32 %v1497_v40, %v2653_v13  ;;  %v1555_v44 = vmul.f32 %v1553_v37, %v2602_v30 }
 0x142   : > { %v878_v2 = vadd.f32 %v873_v7, %v857_v61  ;;  %v858_v17 = vadd.f32 %v854_v8, %v837_v35  ;;  %v953_v35 = vrot.slane %v946_v15, 3  ;;  %v1477_v61 = vmul.f32 %v1476_v54, %v2591_v23 }
 0x143   : > { %v3086_v22 = vpop.permute.xlu2 %1012  ;;  %v1507_v57 = vrot.slane %v1500_v29, 4 }
 0x144   : > { %v879_v26 = vadd.f32 %v3045_v20, %v858_v17  ;;  %v1455_v20 = vstv %s2296_s28  ;;  %v954_v0 = vsel %vm951_vm2, %v952_v52, %v953_v35  ;;  %v956_v8 = vsel %vm951_vm2, %v953_v35, %v955_v55  ;;  %s2285_s28 = sld [smem:[#allocation2 + $0x1c]] }
 0x145   : > { %v1457_v59 = vmul.f32 %v1455_v20, %v2593_v24  ;;  %v1458_v45 = vmul.f32 %v1455_v20, %v2653_v13  ;;  %v1456_v46 = vmul.f32 %v1455_v20, %v2585_v16  ;;  %v1575_v52 = vmul.f32 %v1574_v51, %v2585_v16 }
 0x146   : > { %v1561_v35 = vrot.slane %v1555_v44, 5  ;;  %v1595_v55 = vstv %s2303_s14  ;;  %s2316_s14 = sld [smem:[#allocation2 + $0x5c]] }
 0x147   : > { %1406 = vrot.lane.b32.xlu1 %v1403_v18, %s2489_s23  ;;  %1404 = vrot.lane.b32.xlu0 %v1401_v3, %s2489_s23  ;;  %v1465_v10 = vrot.slane %v1458_v45, 4  ;;  %v1462_v63 = vrot.slane %v1456_v46, 4  ;;  %v1498_v18 = vmul.f32 %v1497_v40, %v2585_v16 }
 0x149   : > { %v896_v12 = vpop.permute.xlu1 %895  ;;  %v894_v33 = vpop.permute.xlu0 %893  ;;  %1425 = vrot.lane.b32.xlu2 %v1422_v25, %s2489_s23  ;;  %v973_v25 = vsel %vm951_vm2, %v970_v4, %v972_v58  ;;  %v1504_v11 = vrot.slane %v1498_v18, 4 }
 0x14a   : > { %v900_v39 = vadd.f32 %v896_v12, %v879_v26  ;;  %v899_v42 = vadd.f32 %v894_v33, %v878_v2  ;;  %v1483_v2 = vrot.slane %v1477_v61, 4  ;;  %v1486_v33 = vrot.slane %v1479_v49, 4 }
 0x14b   : > { %v3107_v47 = vpop.permute.xlu2 %1035 }
 0x14c   : > { %v920_v50 = vadd.f32 %v3059_v43, %v899_v42  ;;  %v1463_v43 = vrot.slane %v1457_v59, 4  ;;  %v1485_v28 = vsel %vm1238_vm3, %v1483_v2, %v1484_v9  ;;  %v1554_v59 = vmul.f32 %v1553_v37, %v2591_v23 }
 0x14e   : > { %v1466_v17 = vsel %vm1238_vm3, %v1463_v43, %v1465_v10  ;;  %v1464_v36 = vsel %vm1238_vm3, %v1462_v63, %v1463_v43  ;;  %v1560_v54 = vrot.slane %v1554_v59, 5  ;;  %v1581_v63 = vrot.slane %v1575_v52, 5 }
 0x14f   : > { %1446 = vrot.lane.b32.xlu1 %v1443_v32, %s2490_s26  ;;  %1427 = vrot.lane.b32.xlu0 %v1424_v14, %s2489_s23  ;;  %v1556_v32 = vmul.f32 %v1553_v37, %v2641_v62  ;;  %v1487_v14 = vsel %vm1238_vm3, %v1484_v9, %v1486_v33 }
 0x150   : > { %v1562_v31 = vsel %vm1525_vm4, %v1560_v54, %v1561_v35 }
 0x151   : > { %v936_v5 = vpop.permute.xlu1 %935  ;;  %v917_v6 = vpop.permute.xlu0 %916  ;;  %1448 = vrot.lane.b32.xlu2 %v1445_v56, %s2490_s26  ;;  %v1563_v53 = vrot.slane %v1556_v32, 5 }
 0x152   : > { %v941_v34 = vadd.f32 %v936_v5, %v920_v50  ;;  %v921_v7 = vadd.f32 %v917_v6, %v900_v39  ;;  %v1597_v5 = vmul.f32 %v1595_v55, %v2602_v30  ;;  %v1577_v6 = vmul.f32 %v1574_v51, %v2653_v13 }
 0x153   : > { %v3130_v21 = vpop.permute.xlu2 %1075  ;;  %v1564_v40 = vsel %vm1525_vm4, %v1561_v35, %v1563_v53 }
 0x154   : > { %v959_v26 = vadd.f32 %v954_v0, %v941_v34  ;;  %v942_v3 = vadd.f32 %v3071_v48, %v921_v7  ;;  %v1505_v48 = vrot.slane %v1499_v19, 4  ;;  %v1596_v0 = vmul.f32 %v1595_v55, %v2591_v23 }
 0x155   : > { %v1598_v7 = vmul.f32 %v1595_v55, %v2641_v62  ;;  %v1603_v2 = vrot.slane %v1597_v5, 5 }
 0x156   : > { %v960_v27 = vadd.f32 %v956_v8, %v942_v3  ;;  %v976_v20 = vadd.f32 %v971_v60, %v959_v26  ;;  %v1506_v50 = vsel %vm1238_vm3, %v1504_v11, %v1505_v48  ;;  %v1508_v41 = vsel %vm1238_vm3, %v1505_v48, %v1507_v57 }
 0x157   : > { %1469 = vrot.lane.b32.xlu1 %v1466_v17, %s2490_s26  ;;  %1467 = vrot.lane.b32.xlu0 %v1464_v36, %s2490_s26  ;;  %v1602_v8 = vrot.slane %v1596_v0, 5  ;;  %v1584_v17 = vrot.slane %v1577_v6, 5  ;;  %v1616_v36 = vstv %s2304_s16  ;;  %v1605_v3 = vrot.slane %v1598_v7, 5  ;;  %s2317_s16 = sld [smem:[#allocation2 + $0x2c]] }
 0x158   : > { %v977_v12 = vadd.f32 %v973_v25, %v960_v27  ;;  %v1618_v49 = vmul.f32 %v1616_v36, %v2593_v24  ;;  %v1619_v9 = vmul.f32 %v1616_v36, %v2653_v13  ;;  %v1617_v60 = vmul.f32 %v1616_v36, %v2585_v16 }
 0x159   : > { %v994_v15 = vpop.permute.xlu1 %993  ;;  %v992_v38 = vpop.permute.xlu0 %991  ;;  %1488 = vrot.lane.b32.xlu2 %v1485_v28, %s2491_s3  ;;  %v1604_v28 = vsel %vm1525_vm4, %v1602_v8, %v1603_v2  ;;  %v1637_v11 = vstv %s2305_s21  ;;  %v1606_v48 = vsel %vm1525_vm4, %v1603_v2, %v1605_v3  ;;  %s2318_s21 = sld [smem:[#allocation2 + $0x5d]] }
 0x15a   : > { %v998_v39 = vadd.f32 %v994_v15, %v977_v12  ;;  %v997_v42 = vadd.f32 %v992_v38, %v976_v20  ;;  %v1638_v20 = vmul.f32 %v1637_v11, %v2591_v23  ;;  %v1624_v12 = vrot.slane %v1618_v49, 5 }
 0x15b   : > { %v3145_v45 = vpop.permute.xlu2 %1098  ;;  %v1626_v33 = vrot.slane %v1619_v9, 5  ;;  %v1623_v37 = vrot.slane %v1617_v60, 5  ;;  %v1658_v15 = vstv %s2306_s22  ;;  %v1639_v38 = vmul.f32 %v1637_v11, %v2602_v30  ;;  %s2319_s22 = sld [smem:[#allocation2 + $0x2d]] }
 0x15c   : > { %v1018_v46 = vadd.f32 %v3086_v22, %v997_v42  ;;  %v1576_v22 = vmul.f32 %v1574_v51, %v2593_v24  ;;  %v1644_v44 = vrot.slane %v1638_v20, 5  ;;  %v1660_v51 = vmul.f32 %v1658_v15, %v2593_v24 }
 0x15d   : > { %v1627_v32 = vsel %vm1525_vm4, %v1624_v12, %v1626_v33  ;;  %v1625_v59 = vsel %vm1525_vm4, %v1623_v37, %v1624_v12  ;;  %v1645_v52 = vrot.slane %v1639_v38, 5  ;;  %v1661_v53 = vmul.f32 %v1658_v15, %v2653_v13 }
 0x15e   : > { %v1582_v58 = vrot.slane %v1576_v22, 5  ;;  %v1666_v55 = vrot.slane %v1660_v51, 5  ;;  %v1231_v12 = vstv %s2285_s28  ;;  %s2324_s28 = sld [smem:[#allocation2 + $0x60]] }
 0x15f   : > { %1509 = vrot.lane.b32.xlu1 %v1506_v50, %s2491_s3  ;;  %1490 = vrot.lane.b32.xlu0 %v1487_v14, %s2491_s3  ;;  %v1646_v35 = vsel %vm1525_vm4, %v1644_v44, %v1645_v52  ;;  %v1233_v44 = vmul.f32 %v1231_v12, %v2602_v30 }
 0x160   : > { %v1583_v34 = vsel %vm1525_vm4, %v1581_v63, %v1582_v58  ;;  %v1585_v29 = vsel %vm1525_vm4, %v1582_v58, %v1584_v17  ;;  %v1668_v63 = vrot.slane %v1661_v53, 5 }
 0x161   : > { %v1034_v56 = vpop.permute.xlu1 %1033  ;;  %v1015_v61 = vpop.permute.xlu0 %1014  ;;  %1511 = vrot.lane.b32.xlu2 %v1508_v41, %s2491_s3  ;;  %v1640_v41 = vmul.f32 %v1637_v11, %v2641_v62 }
 0x162   : > { %v1039_v43 = vadd.f32 %v1034_v56, %v1018_v46  ;;  %v1019_v10 = vadd.f32 %v1015_v61, %v998_v39  ;;  %v1659_v46 = vmul.f32 %v1658_v15, %v2585_v16  ;;  %v1679_v56 = vstv %s2307_s24  ;;  %s2320_s24 = sld [smem:[#allocation2 + $0x5e]] }
 0x163   : > { %v3159_v1 = vpop.permute.xlu2 %1138  ;;  %v1647_v22 = vrot.slane %v1640_v41, 5  ;;  %v1680_v58 = vmul.f32 %v1679_v56, %v2591_v23  ;;  %v1669_v7 = vsel %vm1525_vm4, %v1666_v55, %v1668_v63  ;;  %v1763_v63 = vstv %s3218_s4 }
 0x164   : > { %v1040_v4 = vadd.f32 %v3107_v47, %v1019_v10  ;;  %v1665_v54 = vrot.slane %v1659_v46, 5 }
 0x165   : > { %v1648_v6 = vsel %vm1525_vm4, %v1645_v52, %v1647_v22  ;;  %v1686_v36 = vrot.slane %v1680_v58, 5  ;;  %v1784_v58 = vstv %s3224_s5  ;;  %s2334_s5 = sshll.u32 %s2530_s13, 4 }
 0x166   : > { %v1667_v5 = vsel %vm1525_vm4, %v1665_v54, %v1666_v55 }
 0x167   : > { %1567 = vrot.lane.b32.xlu1 %v1564_v40, %s2487_s7  ;;  %1565 = vrot.lane.b32.xlu0 %v1562_v31, %s2487_s7  ;;  %v1681_v40 = vmul.f32 %v1679_v56, %v2602_v30  ;;  %v1682_v31 = vmul.f32 %v1679_v56, %v2641_v62 }
 0x169   : > { %v1057_v47 = vpop.permute.xlu1 %1056  ;;  %v1055_v18 = vpop.permute.xlu0 %1054  ;;  %1586 = vrot.lane.b32.xlu2 %v1583_v34, %s2487_s7  ;;  %v1700_v34 = vstv %s2308_s25  ;;  %v1687_v2 = vrot.slane %v1681_v40, 5  ;;  %v1689_v17 = vrot.slane %v1682_v31, 5  ;;  %s2321_s25 = sld [smem:[#allocation2 + $0x2e]] }
 0x16a   : > { %v1061_v19 = vadd.f32 %v1057_v47, %v1040_v4  ;;  %v1060_v26 = vadd.f32 %v1055_v18, %v1039_v43  ;;  %v1701_v8 = vmul.f32 %v1700_v34, %v2585_v16  ;;  %v1702_v47 = vmul.f32 %v1700_v34, %v2593_v24 }
 0x16b   : > { %v3172_v25 = vpop.permute.xlu2 %1161  ;;  %v1690_v9 = vsel %vm1525_vm4, %v1687_v2, %v1689_v17  ;;  %v1688_v11 = vsel %vm1525_vm4, %v1686_v36, %v1687_v2 }
 0x16c   : > { %v1081_v27 = vadd.f32 %v3130_v21, %v1060_v26  ;;  %v1707_v49 = vrot.slane %v1701_v8, 5  ;;  %v1708_v20 = vrot.slane %v1702_v47, 5 }
 0x16e   : > { %v1709_v33 = vsel %vm1525_vm4, %v1707_v49, %v1708_v20 }
 0x16f   : > { %1607 = vrot.lane.b32.xlu1 %v1604_v28, %s2486_s6  ;;  %1588 = vrot.lane.b32.xlu0 %v1585_v29, %s2487_s7 }
 0x171   : > { %v1097_v21 = vpop.permute.xlu1 %1096  ;;  %v1078_v39 = vpop.permute.xlu0 %1077  ;;  %1609 = vrot.lane.b32.xlu2 %v1606_v48, %s2486_s6  ;;  %v1703_v48 = vmul.f32 %v1700_v34, %v2653_v13  ;;  %v1765_v34 = vmul.f32 %v1763_v63, %v2602_v30 }
 0x172   : > { %v1102_v42 = vadd.f32 %v1097_v21, %v1081_v27  ;;  %v1082_v57 = vadd.f32 %v1078_v39, %v1061_v19 }
 0x173   : > { %v3186_v50 = vpop.permute.xlu2 %1201  ;;  %v1710_v21 = vrot.slane %v1703_v48, 5  ;;  %v1766_v48 = vmul.f32 %v1763_v63, %v2641_v62 }
 0x174   : > { %v1103_v14 = vadd.f32 %v3145_v45, %v1082_v57  ;;  %v1232_v57 = vmul.f32 %v1231_v12, %v2591_v23 }
 0x175   : > { %v1711_v22 = vsel %vm1525_vm4, %v1708_v20, %v1710_v21  ;;  %v1771_v20 = vrot.slane %v1765_v34, 5 }
 0x177   : > { %1630 = vrot.lane.b32.xlu1 %v1627_v32, %s2486_s6  ;;  %1628 = vrot.lane.b32.xlu0 %v1625_v59, %s2486_s6  ;;  %v1249_v32 = vstv %s2286_s30  ;;  %s2326_s30 = sld [smem:[#allocation2 + $0x61]] }
 0x178   : > { %v1250_v56 = vmul.f32 %v1249_v32, %v2585_v16 }
 0x179   : > { %v1120_v45 = vpop.permute.xlu1 %1119  ;;  %v1118_v61 = vpop.permute.xlu0 %1117  ;;  %1649 = vrot.lane.b32.xlu2 %v1646_v35, %s2488_s17 }
 0x17a   : > { %v1124_v43 = vadd.f32 %v1120_v45, %v1103_v14  ;;  %v1123_v10 = vadd.f32 %v1118_v61, %v1102_v42  ;;  %v1234_v14 = vmul.f32 %v1231_v12, %v2641_v62  ;;  %v1251_v45 = vmul.f32 %v1249_v32, %v2593_v24 }
 0x17b   : > { %v3198_v0 = vpop.permute.xlu2 %1224  ;;  %v1239_v61 = vrot.slane %v1232_v57, 4  ;;  %v1256_v8 = vrot.slane %v1250_v56, 4  ;;  %v1840_v57 = vstv %s3248_s8  ;;  %v1861_v56 = vstv %s2316_s14 }
 0x17c   : > { %v1144_v4 = vadd.f32 %v3159_v1, %v1123_v10  ;;  %v1721_v1 = vstv %s2309_s27  ;;  %v1252_v10 = vmul.f32 %v1249_v32, %v2653_v13  ;;  %v1242_v40 = vrot.slane %v1234_v14, 4  ;;  %s2323_s27 = sld [smem:[#allocation2 + $0x2f]] }
 0x17d   : > { %v1722_v60 = vmul.f32 %v1721_v1, %v2591_v23  ;;  %v1723_v27 = vmul.f32 %v1721_v1, %v2602_v30  ;;  %v1724_v37 = vmul.f32 %v1721_v1, %v2641_v62  ;;  %v1257_v2 = vrot.slane %v1251_v45, 4 }
 0x17e   : > { %v1259_v1 = vrot.slane %v1252_v10, 4 }
 0x17f   : > { %1670 = vrot.lane.b32.xlu1 %v1667_v5, %s2488_s17  ;;  %1651 = vrot.lane.b32.xlu0 %v1648_v6, %s2488_s17  ;;  %v1728_v15 = vrot.slane %v1722_v60, 5  ;;  %v1729_v38 = vrot.slane %v1723_v27, 5  ;;  %v1731_v51 = vrot.slane %v1724_v37, 5  ;;  %v1786_v60 = vmul.f32 %v1784_v58, %v2593_v24 }
 0x180   : > { %v1258_v12 = vsel %vm1238_vm3, %v1256_v8, %v1257_v2 }
 0x181   : > { %v1160_v18 = vpop.permute.xlu1 %1159  ;;  %v1141_v19 = vpop.permute.xlu0 %1140  ;;  %1672 = vrot.lane.b32.xlu2 %v1669_v7, %s2488_s17  ;;  %v1730_v41 = vsel %vm1525_vm4, %v1728_v15, %v1729_v38  ;;  %v1732_v31 = vsel %vm1525_vm4, %v1729_v38, %v1731_v51  ;;  %v1787_v38 = vmul.f32 %v1784_v58, %v2653_v13  ;;  %v1842_v51 = vmul.f32 %v1840_v57, %v2602_v30 }
 0x182   : > { %v1165_v26 = vadd.f32 %v1160_v18, %v1144_v4  ;;  %v1145_v3 = vadd.f32 %v1141_v19, %v1124_v43  ;;  %v1240_v43 = vrot.slane %v1233_v44, 4  ;;  %v1764_v4 = vmul.f32 %v1763_v63, %v2591_v23 }
 0x183   : > { %v3213_v28 = vpop.permute.xlu2 %1299  ;;  %v1794_v14 = vrot.slane %v1787_v38, 5 }
 0x184   : > { %v1166_v29 = vadd.f32 %v3172_v25, %v1145_v3  ;;  %v1742_v25 = vstv %s2310_s29  ;;  %v1241_v7 = vsel %vm1238_vm3, %v1239_v61, %v1240_v43  ;;  %v1243_v19 = vsel %vm1238_vm3, %v1240_v43, %v1242_v40  ;;  %s2300_s29 = sld [smem:[#allocation2 + $0x54]] }
 0x185   : > { %v1744_v52 = vmul.f32 %v1742_v25, %v2593_v24  ;;  %v1745_v35 = vmul.f32 %v1742_v25, %v2653_v13  ;;  %v1743_v53 = vmul.f32 %v1742_v25, %v2585_v16  ;;  %v1862_v61 = vmul.f32 %v1861_v56, %v2585_v16 }
 0x186   : > { %v1848_v43 = vrot.slane %v1842_v51, 6  ;;  %v1882_v40 = vstv %s2317_s16  ;;  %s2144_s16 = scalar_lea.hbm %s3446_s2, %s2334_s5 }
 0x187   : > { %1693 = vrot.lane.b32.xlu1 %v1690_v9, %s2489_s23  ;;  %1691 = vrot.lane.b32.xlu0 %v1688_v11, %s2489_s23  ;;  %v1752_v5 = vrot.slane %v1745_v35, 5  ;;  %v1749_v6 = vrot.slane %v1743_v53, 5  ;;  %v1785_v9 = vmul.f32 %v1784_v58, %v2585_v16 }
 0x189   : > { %v1183_v39 = vpop.permute.xlu1 %1182  ;;  %v1181_v42 = vpop.permute.xlu0 %1180  ;;  %1712 = vrot.lane.b32.xlu2 %v1709_v33, %s2489_s23  ;;  %v1260_v33 = vsel %vm1238_vm3, %v1257_v2, %v1259_v1  ;;  %v1791_v21 = vrot.slane %v1785_v9, 5 }
 0x18a   : > { %v1187_v59 = vadd.f32 %v1183_v39, %v1166_v29  ;;  %v1186_v46 = vadd.f32 %v1181_v42, %v1165_v26  ;;  %v1770_v26 = vrot.slane %v1764_v4, 5  ;;  %v1773_v42 = vrot.slane %v1766_v48, 5 }
 0x18b   : > { %v3234_v54 = vpop.permute.xlu2 %1322 }
 0x18c   : > { %v1207_v55 = vadd.f32 %v3186_v50, %v1186_v46  ;;  %v1750_v50 = vrot.slane %v1744_v52, 5  ;;  %v1772_v15 = vsel %vm1525_vm4, %v1770_v26, %v1771_v20  ;;  %v1841_v52 = vmul.f32 %v1840_v57, %v2591_v23 }
 0x18e   : > { %v1753_v3 = vsel %vm1525_vm4, %v1750_v50, %v1752_v5  ;;  %v1751_v49 = vsel %vm1525_vm4, %v1749_v6, %v1750_v50  ;;  %v1847_v63 = vrot.slane %v1841_v52, 6  ;;  %v1868_v6 = vrot.slane %v1862_v61, 6 }
 0x18f   : > { %1733 = vrot.lane.b32.xlu1 %v1730_v41, %s2490_s26  ;;  %1714 = vrot.lane.b32.xlu0 %v1711_v22, %s2489_s23  ;;  %v1843_v41 = vmul.f32 %v1840_v57, %v2641_v62  ;;  %v1774_v22 = vsel %vm1525_vm4, %v1771_v20, %v1773_v42 }
 0x190   : > { %v1849_v34 = vsel %vm1812_vm5, %v1847_v63, %v1848_v43 }
 0x191   : > { %v1223_v17 = vpop.permute.xlu1 %1222  ;;  %v1204_v36 = vpop.permute.xlu0 %1203  ;;  %1735 = vrot.lane.b32.xlu2 %v1732_v31, %s2490_s26  ;;  %v1850_v10 = vrot.slane %v1843_v41, 6 }
 0x192   : > { %v1228_v47 = vadd.f32 %v1223_v17, %v1207_v55  ;;  %v1208_v18 = vadd.f32 %v1204_v36, %v1187_v59  ;;  %v1884_v17 = vmul.f32 %v1882_v40, %v2602_v30  ;;  %v1864_v36 = vmul.f32 %v1861_v56, %v2653_v13 }
 0x193   : > { %v3257_v27 = vpop.permute.xlu2 %1362  ;;  %v1851_v58 = vsel %vm1812_vm5, %v1848_v43, %v1850_v10 }
 0x194   : > { %v1246_v29 = vadd.f32 %v1241_v7, %v1228_v47  ;;  %v1229_v11 = vadd.f32 %v3198_v0, %v1208_v18  ;;  %v1792_v0 = vrot.slane %v1786_v60, 5  ;;  %v1883_v7 = vmul.f32 %v1882_v40, %v2591_v23 }
 0x195   : > { %v1885_v18 = vmul.f32 %v1882_v40, %v2641_v62  ;;  %v1890_v26 = vrot.slane %v1884_v17, 6 }
 0x196   : > { %v1247_v37 = vadd.f32 %v1243_v19, %v1229_v11  ;;  %v1263_v25 = vadd.f32 %v1258_v12, %v1246_v29  ;;  %v1793_v55 = vsel %vm1525_vm4, %v1791_v21, %v1792_v0  ;;  %v1795_v45 = vsel %vm1525_vm4, %v1792_v0, %v1794_v14 }
 0x197   : > { %1756 = vrot.lane.b32.xlu1 %v1753_v3, %s2490_s26  ;;  %1754 = vrot.lane.b32.xlu0 %v1751_v49, %s2490_s26  ;;  %v1889_v19 = vrot.slane %v1883_v7, 6  ;;  %v1871_v3 = vrot.slane %v1864_v36, 6  ;;  %v1903_v49 = vstv %s2318_s21  ;;  %v1892_v11 = vrot.slane %v1885_v18, 6 }
 0x198   : > { %v1264_v39 = vadd.f32 %v1260_v33, %v1247_v37  ;;  %v1905_v48 = vmul.f32 %v1903_v49, %v2593_v24  ;;  %v1906_v20 = vmul.f32 %v1903_v49, %v2653_v13  ;;  %v1904_v12 = vmul.f32 %v1903_v49, %v2585_v16 }
 0x199   : > { %v1281_v44 = vpop.permute.xlu1 %1280  ;;  %v1279_v32 = vpop.permute.xlu0 %1278  ;;  %1775 = vrot.lane.b32.xlu2 %v1772_v15, %s2491_s3  ;;  %v1891_v15 = vsel %vm1812_vm5, %v1889_v19, %v1890_v26  ;;  %v1924_v21 = vstv %s2319_s22  ;;  %v1893_v0 = vsel %vm1812_vm5, %v1890_v26, %v1892_v11  ;;  %s2147_s22 = sshll.u32 %s2144_s16, 4  ;;  %s2148_s22 = int_to_ptr.hbm [resolvable:$true] %s2147_s22 }
 0x19a   : > { %v1285_v59 = vadd.f32 %v1281_v44, %v1264_v39  ;;  %v1284_v46 = vadd.f32 %v1279_v32, %v1263_v25  ;;  %v1925_v25 = vmul.f32 %v1924_v21, %v2591_v23  ;;  %v1911_v39 = vrot.slane %v1905_v48, 6 }
 0x19b   : > { %v3272_v35 = vpop.permute.xlu2 %1385  ;;  %v1913_v42 = vrot.slane %v1906_v20, 6  ;;  %v1910_v57 = vrot.slane %v1904_v12, 6  ;;  %v1945_v44 = vstv %s2320_s24  ;;  %v1926_v32 = vmul.f32 %v1924_v21, %v2602_v30 }
 0x19c   : > { %v1305_v53 = vadd.f32 %v3213_v28, %v1284_v46  ;;  %v1863_v28 = vmul.f32 %v1861_v56, %v2593_v24  ;;  %v1931_v51 = vrot.slane %v1925_v25, 6  ;;  %v1947_v56 = vmul.f32 %v1945_v44, %v2593_v24 }
 0x19d   : > { %v1914_v41 = vsel %vm1812_vm5, %v1911_v39, %v1913_v42  ;;  %v1912_v52 = vsel %vm1812_vm5, %v1910_v57, %v1911_v39  ;;  %v1932_v61 = vrot.slane %v1926_v32, 6  ;;  %v1948_v10 = vmul.f32 %v1945_v44, %v2653_v13 }
 0x19e   : > { %v1869_v1 = vrot.slane %v1863_v28, 6  ;;  %v1953_v40 = vrot.slane %v1947_v56, 6 }
 0x19f   : > { %1796 = vrot.lane.b32.xlu1 %v1793_v55, %s2491_s3  ;;  %1777 = vrot.lane.b32.xlu0 %v1774_v22, %s2491_s3  ;;  %v1933_v43 = vsel %vm1812_vm5, %v1931_v51, %v1932_v61 }
 0x1a0   : > { %v1870_v47 = vsel %vm1812_vm5, %v1868_v6, %v1869_v1  ;;  %v1872_v38 = vsel %vm1812_vm5, %v1869_v1, %v1871_v3  ;;  %v1955_v6 = vrot.slane %v1948_v10, 6 }
 0x1a1   : > { %v1321_v31 = vpop.permute.xlu1 %1320  ;;  %v1302_v4 = vpop.permute.xlu0 %1301  ;;  %1798 = vrot.lane.b32.xlu2 %v1795_v45, %s2491_s3  ;;  %v1927_v45 = vmul.f32 %v1924_v21, %v2641_v62 }
 0x1a2   : > { %v1326_v50 = vadd.f32 %v1321_v31, %v1305_v53  ;;  %v1306_v5 = vadd.f32 %v1302_v4, %v1285_v59  ;;  %v1946_v53 = vmul.f32 %v1945_v44, %v2585_v16  ;;  %v1966_v31 = vstv %s2321_s25  ;;  %s2431_s25 = sshra.s32 %s2148_s22, 4  ;;  %s2432_s25 = int_to_ptr.hbm [resolvable:$true] %s2431_s25 }
 0x1a3   : > { %v3286_v8 = vpop.permute.xlu2 %1425  ;;  %v1934_v28 = vrot.slane %v1927_v45, 6  ;;  %v1967_v1 = vmul.f32 %v1966_v31, %v2591_v23  ;;  %v1956_v18 = vsel %vm1812_vm5, %v1953_v40, %v1955_v6  ;;  %p2438_p3 = scmp.lt.s32.totalorder %s2432_s25, %s3446_s2 }
 0x1a4   : > { %v1327_v2 = vadd.f32 %v3234_v54, %v1306_v5  ;;  %v1952_v63 = vrot.slane %v1946_v53, 6 }
 0x1a5   : > { %v1935_v36 = vsel %vm1812_vm5, %v1932_v61, %v1934_v28  ;;  %v1973_v49 = vrot.slane %v1967_v1, 6  ;;  %v2071_v1 = vstv %s2326_s30 }
 0x1a6   : > { %v1954_v17 = vsel %vm1812_vm5, %v1952_v63, %v1953_v40 }
 0x1a7   : > { %1854 = vrot.lane.b32.xlu1 %v1851_v58, %s2487_s7  ;;  %1852 = vrot.lane.b32.xlu0 %v1849_v34, %s2487_s7  ;;  %v1968_v58 = vmul.f32 %v1966_v31, %v2602_v30  ;;  %v1969_v34 = vmul.f32 %v1966_v31, %v2641_v62 }
 0x1a9   : > { %v1344_v54 = vpop.permute.xlu1 %1343  ;;  %v1342_v9 = vpop.permute.xlu0 %1341  ;;  %1873 = vrot.lane.b32.xlu2 %v1870_v47, %s2487_s7  ;;  %v1974_v26 = vrot.slane %v1968_v58, 6  ;;  %v1976_v3 = vrot.slane %v1969_v34, 6 }
 0x1aa   : > { %v1348_v60 = vadd.f32 %v1344_v54, %v1327_v2  ;;  %v1347_v29 = vadd.f32 %v1342_v9, %v1326_v50 }
 0x1ab   : > { %v3299_v33 = vpop.permute.xlu2 %1448  ;;  %v1977_v20 = vsel %vm1812_vm5, %v1974_v26, %v1976_v3  ;;  %v1975_v21 = vsel %vm1812_vm5, %v1973_v49, %v1974_v26 }
 0x1ac   : > { %v1368_v37 = vadd.f32 %v3257_v27, %v1347_v29 }
 0x1af   : > { %1894 = vrot.lane.b32.xlu1 %v1891_v15, %s2486_s6  ;;  %1875 = vrot.lane.b32.xlu0 %v1872_v38, %s2487_s7  ;;  %s2322_s7 = sld [smem:[#allocation2 + $0x5f]] }
 0x1b1   : > { %v1384_v27 = vpop.permute.xlu1 %1383  ;;  %v1365_v59 = vpop.permute.xlu0 %1364  ;;  %1896 = vrot.lane.b32.xlu2 %v1893_v0, %s2486_s6 }
 0x1b2   : > { %v1389_v46 = vadd.f32 %v1384_v27, %v1368_v37  ;;  %v1369_v14 = vadd.f32 %v1365_v59, %v1348_v60 }
 0x1b3   : > { %v3313_v55 = vpop.permute.xlu2 %1488 }
 0x1b4   : > { %v1390_v22 = vadd.f32 %v3272_v35, %v1369_v14 }
 0x1b5   : > { %v1987_v47 = vstv %s2322_s7  ;;  %s2433_s7 = scalar_lea.hbm %s2432_s25, 16 }
 0x1b6   : > { %v1988_v19 = vmul.f32 %v1987_v47, %v2585_v16  ;;  %v1989_v54 = vmul.f32 %v1987_v47, %v2593_v24  ;;  %v1990_v0 = vmul.f32 %v1987_v47, %v2653_v13  ;;  %p2434_p0 = scmp.ne.s32.totalorder %s2432_s25, %s2433_s7 }
 0x1b7   : > { %1917 = vrot.lane.b32.xlu1 %v1914_v41, %s2486_s6  ;;  %1915 = vrot.lane.b32.xlu0 %v1912_v52, %s2486_s6  ;;  %s2299_s6 = sld [smem:[#allocation2 + $0x23]]  ;;  %v1536_v41 = vstv %s2300_s29 }
 0x1b8   : > { %v1994_v48 = vrot.slane %v1988_v19, 6  ;;  %v1995_v25 = vrot.slane %v1989_v54, 6  ;;  %v1997_v27 = vrot.slane %v1990_v0, 6  ;;  %p2435_p1 = pnand %p2434_p0, %p2547_p5 }
 0x1b9   : > { %v1407_v35 = vpop.permute.xlu1 %1406  ;;  %v1405_v4 = vpop.permute.xlu0 %1404  ;;  %1936 = vrot.lane.b32.xlu2 %v1933_v43, %s2488_s17 }
 0x1ba   : > { %v1411_v50 = vadd.f32 %v1407_v35, %v1390_v22  ;;  %v1410_v5 = vadd.f32 %v1405_v4, %v1389_v46  ;;  %v1996_v42 = vsel %vm1812_vm5, %v1994_v48, %v1995_v25  ;;  %v2029_v46 = vstv %s2324_s28  ;;  %p2436_p2 = pneg %p2435_p1  ;;  %s2437_s28 = scalar_lea.hbm %s3446_s2, 32 }
 0x1bb   : > { %v3325_v7 = vpop.permute.xlu2 %1511  ;;  %v2031_v61 = vmul.f32 %v2029_v46, %v2593_v24  ;;  %v2032_v43 = vmul.f32 %v2029_v46, %v2653_v13  ;;  %v2030_v10 = vmul.f32 %v2029_v46, %v2585_v16  ;;  %v1998_v28 = vsel %vm1812_vm5, %v1995_v25, %v1997_v27  ;;  %p2439_p4 = scmp.lt.s32.totalorder %s2437_s28, %s2433_s7 }
 0x1bc   : > { %v1431_v2 = vadd.f32 %v3286_v8, %v1410_v5  ;;  %v2008_v8 = vstv %s2323_s27  ;;  %v1538_v4 = vmul.f32 %v1536_v41, %v2593_v24  ;;  %v1537_v5 = vmul.f32 %v1536_v41, %v2585_v16 }
 0x1bd   : > { %v2009_v12 = vmul.f32 %v2008_v8, %v2591_v23  ;;  %v2010_v37 = vmul.f32 %v2008_v8, %v2602_v30  ;;  %v1518_v39 = vstv %s2299_s6  ;;  %v2011_v57 = vmul.f32 %v2008_v8, %v2641_v62  ;;  %p2440_p7 = por %p2439_p4, %p2438_p3 }
 0x1be   : > { %v1520_v59 = vmul.f32 %v1518_v39, %v2602_v30  ;;  %v1521_v22 = vmul.f32 %v1518_v39, %v2641_v62  ;;  %v1544_v3 = vrot.slane %v1538_v4, 5  ;;  %v1543_v8 = vrot.slane %v1537_v5, 5 }
 0x1bf   : > { %1957 = vrot.lane.b32.xlu1 %v1954_v17, %s2488_s17  ;;  %1938 = vrot.lane.b32.xlu0 %v1935_v36, %s2488_s17  ;;  %v2015_v44 = vrot.slane %v2009_v12, 6  ;;  %v2016_v32 = vrot.slane %v2010_v37, 6  ;;  %v2018_v56 = vrot.slane %v2011_v57, 6  ;;  %v2039_v17 = vrot.slane %v2032_v43, 6  ;;  %p2441_p8 = pnand %p2440_p7, %p2436_p2 }
 0x1c0   : > { %v1527_v35 = vrot.slane %v1520_v59, 5  ;;  %v1529_v58 = vrot.slane %v1521_v22, 5  ;;  %v2036_v36 = vrot.slane %v2030_v10, 6  ;;  %v2073_v12 = vmul.f32 %v2071_v1, %v2593_v24 }
 0x1c1   : > { %v1447_v9 = vpop.permute.xlu1 %1446  ;;  %v1428_v60 = vpop.permute.xlu0 %1427  ;;  %1959 = vrot.lane.b32.xlu2 %v1956_v18, %s2488_s17  ;;  %s3345_s17 = sld [smem:[#allocation2 + $0x30]]  ;;  %v2017_v45 = vsel %vm1812_vm5, %v2015_v44, %v2016_v32  ;;  %v2019_v34 = vsel %vm1812_vm5, %v2016_v32, %v2018_v56  ;;  %v2074_v32 = vmul.f32 %v2071_v1, %v2653_v13 }
 0x1c2   : > { %v1452_v29 = vadd.f32 %v1447_v9, %v1431_v2  ;;  %v1432_v11 = vadd.f32 %v1428_v60, %v1411_v50  ;;  %v1539_v50 = vmul.f32 %v1536_v41, %v2653_v13  ;;  %v1530_v60 = vsel %vm1525_vm4, %v1527_v35, %v1529_v58 }
 0x1c3   : > { %v3340_v15 = vpop.permute.xlu2 %1586 }
 0x1c4   : > { %v1453_v38 = vadd.f32 %v3299_v33, %v1432_v11  ;;  %v1519_v33 = vmul.f32 %v1518_v39, %v2591_v23  ;;  %v1546_v49 = vrot.slane %v1539_v50, 5 }
 0x1c6   : > { %v1526_v31 = vrot.slane %v1519_v33, 5  ;;  %v1547_v39 = vsel %vm1525_vm4, %v1544_v3, %v1546_v49 }
 0x1c7   : > { %1980 = vrot.lane.b32.xlu1 %v1977_v20, %s2489_s23  ;;  %1978 = vrot.lane.b32.xlu0 %v1975_v21, %s2489_s23  ;;  %v2050_v6 = vstv %s3345_s17  ;;  %v2072_v20 = vmul.f32 %v2071_v1, %v2585_v16 }
 0x1c8   : > { %v2051_v2 = vmul.f32 %v2050_v6, %v2591_v23  ;;  %v2052_v47 = vmul.f32 %v2050_v6, %v2602_v30  ;;  %v1528_v18 = vsel %vm1525_vm4, %v1526_v31, %v1527_v35  ;;  %v2053_v0 = vmul.f32 %v2050_v6, %v2641_v62 }
 0x1c9   : > { %v1470_v14 = vpop.permute.xlu1 %1469  ;;  %v1468_v51 = vpop.permute.xlu0 %1467  ;;  %1999 = vrot.lane.b32.xlu2 %v1996_v42, %s2489_s23  ;;  %v1545_v42 = vsel %vm1525_vm4, %v1543_v8, %v1544_v3  ;;  %v2078_v27 = vrot.slane %v2072_v20, 6 }
 0x1ca   : > { %v1474_v52 = vadd.f32 %v1470_v14, %v1453_v38  ;;  %v1473_v53 = vadd.f32 %v1468_v51, %v1452_v29  ;;  %v2057_v29 = vrot.slane %v2051_v2, 6  ;;  %v2058_v25 = vrot.slane %v2052_v47, 6 }
 0x1cb   : > { %v3359_v63 = vpop.permute.xlu2 %1609  ;;  %v2060_v46 = vrot.slane %v2053_v0, 6 }
 0x1cc   : > { %v1494_v40 = vadd.f32 %v3313_v55, %v1473_v53  ;;  %v2037_v55 = vrot.slane %v2031_v61, 6  ;;  %v2059_v44 = vsel %vm1812_vm5, %v2057_v29, %v2058_v25  ;;  %v2081_v53 = vrot.slane %v2074_v32, 6 }
 0x1cd   : > { %v2061_v61 = vsel %vm1812_vm5, %v2058_v25, %v2060_v46 }
 0x1ce   : > { %v2040_v11 = vsel %vm1812_vm5, %v2037_v55, %v2039_v17  ;;  %v2038_v48 = vsel %vm1812_vm5, %v2036_v36, %v2037_v55 }
 0x1cf   : > { %2020 = vrot.lane.b32.xlu1 %v2017_v45, %s2490_s26  ;;  %2001 = vrot.lane.b32.xlu0 %v1998_v28, %s2489_s23  ;;  %s2313_s23 = sld [smem:[#allocation2 + $0x2a]] }
 0x1d1   : > { %v1510_v19 = vpop.permute.xlu1 %1509  ;;  %v1491_v26 = vpop.permute.xlu0 %1490  ;;  %2022 = vrot.lane.b32.xlu2 %v2019_v34, %s2490_s26 }
 0x1d2   : > { %v1515_v54 = vadd.f32 %v1510_v19, %v1494_v40  ;;  %v1495_v9 = vadd.f32 %v1491_v26, %v1474_v52 }
 0x1d3   : > { %v1650_v37 = vpop.permute.xlu2 %1649 }
 0x1d4   : > { %v1533_v38 = vadd.f32 %v1528_v18, %v1515_v54  ;;  %v1516_v21 = vadd.f32 %v3325_v7, %v1495_v9  ;;  %v2079_v7 = vrot.slane %v2073_v12, 6 }
 0x1d5   : > { %v1805_v25 = vstv %s2313_s23 }
 0x1d6   : > { %v1534_v57 = vadd.f32 %v1530_v60, %v1516_v21  ;;  %v1550_v59 = vadd.f32 %v1545_v42, %v1533_v38  ;;  %v2080_v45 = vsel %vm1812_vm5, %v2078_v27, %v2079_v7  ;;  %v2082_v43 = vsel %vm1812_vm5, %v2079_v7, %v2081_v53 }
 0x1d7   : > { %2043 = vrot.lane.b32.xlu1 %v2040_v11, %s2490_s26  ;;  %2041 = vrot.lane.b32.xlu0 %v2038_v48, %s2490_s26  ;;  %s2314_s26 = sld [smem:[#allocation2 + $0x5b]] }
 0x1d8   : > { %v1551_v33 = vadd.f32 %v1547_v39, %v1534_v57 }
 0x1d9   : > { %v1568_v14 = vpop.permute.xlu1 %1567  ;;  %v1566_v51 = vpop.permute.xlu0 %1565  ;;  %2062 = vrot.lane.b32.xlu2 %v2059_v44, %s2491_s3  ;;  %v1806_v44 = vmul.f32 %v1805_v25, %v2591_v23 }
 0x1da   : > { %v1572_v41 = vadd.f32 %v1568_v14, %v1551_v33  ;;  %v1571_v52 = vadd.f32 %v1566_v51, %v1550_v59  ;;  %v1808_v59 = vmul.f32 %v1805_v25, %v2641_v62 }
 0x1db   : > { %v1673_v22 = vpop.permute.xlu2 %1672  ;;  %v1813_v46 = vrot.slane %v1806_v44, 6 }
 0x1dc   : > { %v1592_v56 = vadd.f32 %v3340_v15, %v1571_v52 }
 0x1dd   : > { %v1823_v33 = vstv %s2314_s26 }
 0x1de   : > { %v1825_v51 = vmul.f32 %v1823_v33, %v2593_v24  ;;  %v1826_v23 = vmul.f32 %v1823_v33, %v2653_v13 }
 0x1df   : > { %2083 = vrot.lane.b32.xlu1 %v2080_v45, %s2491_s3  ;;  %2064 = vrot.lane.b32.xlu0 %v2061_v61, %s2491_s3 }
 0x1e1   : > { %v1608_v10 = vpop.permute.xlu1 %1607  ;;  %v1589_v40 = vpop.permute.xlu0 %1588  ;;  %2085 = vrot.lane.b32.xlu2 %v2082_v43, %s2491_s3  ;;  %s148_s3 = sand.u32 1, %s2475_s10  }
 0x1e2   : > { %v1613_v28 = vadd.f32 %v1608_v10, %v1592_v56  ;;  %v1593_v31 = vadd.f32 %v1589_v40, %v1572_v41  ;;  %v1824_v41 = vmul.f32 %v1823_v33, %v2585_v16  ;;  %v1816_v56 = vrot.slane %v1808_v59, 6  ;;  %s2228_s4 = sshll.u32 %s148_s3, 4  ;;  %s2133_s24 = scalar_lea.sflag [#allocation3], %s148_s3 }
 0x1e3   : > { %v1713_v35 = vpop.permute.xlu2 %1712  ;;  %v1831_v10 = vrot.slane %v1825_v51, 6  ;;  %s150_s13 = scalar_lea.vmem [#allocation5], %s2228_s4 }
 0x1e4   : > { %v1614_v4 = vadd.f32 %v3359_v63, %v1593_v31  ;;  %v1830_v62 = vrot.slane %v1824_v41, 6  ;;  %v1833_v31 = vrot.slane %v1826_v23, 6  ;;  %s2145_s21 = sshll.u32 %s150_s13, 4  ;;  %s2146_s21 = int_to_ptr.vmem [resolvable:$true] %s2145_s21 }
 0x1e6   : > { %v1832_v16 = vsel %vm1812_vm5, %v1830_v62, %v1831_v10 }
 0x1e9   : > { %v1631_v15 = vpop.permute.xlu1 %1630  ;;  %v1629_v50 = vpop.permute.xlu0 %1628 }
 0x1ea   : > { %v1634_v49 = vadd.f32 %v1629_v50, %v1613_v28  ;;  %v1635_v54 = vadd.f32 %v1631_v15, %v1614_v4  ;;  %v1834_v4 = vsel %vm1812_vm5, %v1831_v10, %v1833_v31 }
 0x1eb   : > { %v1736_v5 = vpop.permute.xlu2 %1735 }
 0x1ec   : > { %v1655_v63 = vadd.f32 %v1650_v37, %v1634_v49  ;;  %v1807_v37 = vmul.f32 %v1805_v25, %v2602_v30 }
 0x1ee   : > { %v1814_v14 = vrot.slane %v1807_v37, 6 }
 0x1f0   : > { %v1815_v43 = vsel %vm1812_vm5, %v1813_v46, %v1814_v14  ;;  %v1817_v28 = vsel %vm1812_vm5, %v1814_v14, %v1816_v56 }
 0x1f1   : > { %v1671_v6 = vpop.permute.xlu1 %1670  ;;  %v1652_v58 = vpop.permute.xlu0 %1651 }
 0x1f2   : > { %v1656_v9 = vadd.f32 %v1652_v58, %v1635_v54  ;;  %v1676_v11 = vadd.f32 %v1671_v6, %v1655_v63 }
 0x1f3   : > { %v1776_v34 = vpop.permute.xlu2 %1775 }
 0x1f4   : > { %v1677_v48 = vadd.f32 %v1673_v22, %v1656_v9 }
 0x1f9   : > { %v1694_v2 = vpop.permute.xlu1 %1693  ;;  %v1692_v55 = vpop.permute.xlu0 %1691 }
 0x1fa   : > { %v1697_v20 = vadd.f32 %v1692_v55, %v1676_v11  ;;  %v1698_v12 = vadd.f32 %v1694_v2, %v1677_v48 }
 0x1fb   : > { %v1799_v17 = vpop.permute.xlu2 %1798 }
 0x1fc   : > { %v1718_v21 = vadd.f32 %v1713_v35, %v1697_v20 }
 0x201   : > { %v1734_v36 = vpop.permute.xlu1 %1733  ;;  %v1715_v1 = vpop.permute.xlu0 %1714 }
 0x202   : > { %v1719_v0 = vadd.f32 %v1715_v1, %v1698_v12  ;;  %v1739_v57 = vadd.f32 %v1734_v36, %v1718_v21 }
 0x203   : > { %v1874_v19 = vpop.permute.xlu2 %1873 }
 0x204   : > { %v1740_v32 = vadd.f32 %v1736_v5, %v1719_v0 }
 0x209   : > { %v1757_v47 = vpop.permute.xlu1 %1756  ;;  %v1755_v18 = vpop.permute.xlu0 %1754 }
 0x20a   : > { %v1760_v27 = vadd.f32 %v1755_v18, %v1739_v57  ;;  %v1761_v7 = vadd.f32 %v1757_v47, %v1740_v32 }
 0x20b   : > { %v1897_v8 = vpop.permute.xlu2 %1896 }
 0x20c   : > { %v1781_v52 = vadd.f32 %v1776_v34, %v1760_v27 }
 0x211   : > { %v1797_v26 = vpop.permute.xlu1 %1796  ;;  %v1778_v3 = vpop.permute.xlu0 %1777 }
 0x212   : > { %v1782_v53 = vadd.f32 %v1778_v3, %v1761_v7  ;;  %v1802_v61 = vadd.f32 %v1797_v26, %v1781_v52 }
 0x213   : > { %v1937_v38 = vpop.permute.xlu2 %1936 }
 0x214   : > { %v1803_v40 = vadd.f32 %v1799_v17, %v1782_v53  ;;  %v1820_v24 = vadd.f32 %v1815_v43, %v1802_v61 }
 0x216   : > { %v1821_v35 = vadd.f32 %v1817_v28, %v1803_v40  ;;  %v1837_v13 = vadd.f32 %v1832_v16, %v1820_v24 }
 0x218   : > { %v1838_v6 = vadd.f32 %v1834_v4, %v1821_v35 }
 0x219   : > { %v1855_v60 = vpop.permute.xlu1 %1854  ;;  %v1853_v29 = vpop.permute.xlu0 %1852 }
 0x21a   : > { %v1858_v58 = vadd.f32 %v1853_v29, %v1837_v13  ;;  %v1859_v34 = vadd.f32 %v1855_v60, %v1838_v6 }
 0x21b   : > { %v1960_v22 = vpop.permute.xlu2 %1959 }
 0x21c   : > { %v1879_v2 = vadd.f32 %v1874_v19, %v1858_v58 }
 0x221   : > { %v1895_v39 = vpop.permute.xlu1 %1894  ;;  %v1876_v42 = vpop.permute.xlu0 %1875 }
 0x222   : > { %v1900_v17 = vadd.f32 %v1895_v39, %v1879_v2  ;;  %v1880_v1 = vadd.f32 %v1876_v42, %v1859_v34 }
 0x223   : > { %v2000_v5 = vpop.permute.xlu2 %1999 }
 0x224   : > { %v1901_v26 = vadd.f32 %v1897_v8, %v1880_v1 }
 0x229   : > { %v1918_v45 = vpop.permute.xlu1 %1917  ;;  %v1916_v30 = vpop.permute.xlu0 %1915 }
 0x22a   : > { %v1921_v47 = vadd.f32 %v1916_v30, %v1900_v17  ;;  %v1922_v3 = vadd.f32 %v1918_v45, %v1901_v26 }
 0x22b   : > { %v2023_v18 = vpop.permute.xlu2 %2022 }
 0x22c   : > { %v1942_v49 = vadd.f32 %v1937_v38, %v1921_v47 }
 0x231   : > { %v1958_v15 = vpop.permute.xlu1 %1957  ;;  %v1939_v50 = vpop.permute.xlu0 %1938 }
 0x232   : > { %v1963_v9 = vadd.f32 %v1958_v15, %v1942_v49  ;;  %v1943_v11 = vadd.f32 %v1939_v50, %v1922_v3 }
 0x233   : > { %v2063_v12 = vpop.permute.xlu2 %2062 }
 0x234   : > { %v1964_v20 = vadd.f32 %v1960_v22, %v1943_v11 }
 0x239   : > { %v1981_v55 = vpop.permute.xlu1 %1980  ;;  %v1979_v36 = vpop.permute.xlu0 %1978 }
 0x23a   : > { %v1984_v48 = vadd.f32 %v1979_v36, %v1963_v9  ;;  %v1985_v21 = vadd.f32 %v1981_v55, %v1964_v20 }
 0x23b   : > { %v2086_v8 = vpop.permute.xlu2 %2085 }
 0x23c   : > { %v2005_v29 = vadd.f32 %v2000_v5, %v1984_v48 }
 0x241   : > { %v2021_v54 = vpop.permute.xlu1 %2020  ;;  %v2002_v63 = vpop.permute.xlu0 %2001 }
 0x242   : > { %v2026_v0 = vadd.f32 %v2021_v54, %v2005_v29  ;;  %v2006_v25 = vadd.f32 %v2002_v63, %v1985_v21 }
 0x244   : > { %v2027_v42 = vadd.f32 %v2023_v18, %v2006_v25 }
 0x249   : > { %v2044_v60 = vpop.permute.xlu1 %2043  ;;  %v2042_v19 = vpop.permute.xlu0 %2041 }
 0x24a   : > { %v2047_v39 = vadd.f32 %v2042_v19, %v2026_v0  ;;  %v2048_v57 = vadd.f32 %v2044_v60, %v2027_v42 }
 0x24c   : > { %v2068_v44 = vadd.f32 %v2063_v12, %v2047_v39 }
 0x251   : > { %v2084_v38 = vpop.permute.xlu1 %2083  ;;  %v2065_v37 = vpop.permute.xlu0 %2064 }
 0x252   : > { %v2089_v32 = vadd.f32 %v2084_v38, %v2068_v44  ;;  %v2069_v27 = vadd.f32 %v2065_v37, %v2048_v57 }
 0x254   : > { %v2327_v33 = vmul.f32 -1.442695, %v2089_v32  ;;  %v2090_v59 = vadd.f32 %v2086_v8, %v2069_v27 }
 0x256   : > { %2394 = vpow2.f32 %v2327_v33  ;;  %v2328_v7 = vmul.f32 -1.442695, %v2090_v59 }
 0x258   : > { %2396 = vpow2.f32 %v2328_v7 }
 0x25c   : > { %v2395_v46 = vpop.eup %2394 }
 0x25d   : > { %v2097_v14 = vadd.f32 1.0, %v2395_v46 }
 0x25e   : > { %v2397_v51 = vpop.eup %2396 }
 0x25f   : > { %2398 = vrcp.f32 %v2097_v14  ;;  %v2098_v41 = vadd.f32 1.0, %v2397_v51  ;;  %v2110_v23 = vand.u32 2147483648, %v2097_v14  ;;  %v2108_v61 = vand.u32 2147483647, %v2097_v14 }
 0x260   : > { %vm2104_vm7 = vweird.f32 %v2097_v14 }
 0x261   : > { %2400 = vrcp.f32 %v2098_v41  ;;  %v2125_v62 = vand.u32 2147483648, %v2098_v41  ;;  %v2111_v40 = vor.u32 1.1754944e-38, %v2110_v23  ;;  %v2123_v31 = vand.u32 2147483647, %v2098_v41 }
 0x262   : > { %vm2109_vm11 = vcmp.eq.f32.partialorder %v2108_v61, 8.507059e+37  ;;  %vm2119_vm12 = vweird.f32 %v2098_v41 }
 0x263   : > { %v2126_v4 = vor.u32 1.1754944e-38, %v2125_v62  ;;  %vm2124_vm14 = vcmp.eq.f32.partialorder %v2123_v31, 8.507059e+37 }
 0x265   : > { %v2399_v52 = vpop.eup %2398 }
 0x266   : > { %v2100_v53 = vmul.f32 %v2399_v52, %v2097_v14  ;;  %vm2105_vm6 = vweird.f32 %v2399_v52 }
 0x267   : > { %v2401_v22 = vpop.eup %2400  ;;  %vm2106_vm9 = vmor %vm2104_vm7, %vm2105_vm6 }
 0x268   : > { %v2101_v56 = vsub.f32 1.0, %v2100_v53  ;;  %v2115_v45 = vmul.f32 %v2401_v22, %v2098_v41  ;;  %vm2120_vm10 = vweird.f32 %v2401_v22 }
 0x269   : > { %vm2121_vm13 = vmor %vm2119_vm12, %vm2120_vm10 }
 0x26a   : > { %v2102_v30 = vmul.f32 %v2399_v52, %v2101_v56  ;;  %v2116_v43 = vsub.f32 1.0, %v2115_v45 }
 0x26c   : > { %v2103_v10 = vadd.f32 %v2399_v52, %v2102_v30  ;;  %v2117_v28 = vmul.f32 %v2401_v22, %v2116_v43 }
 0x26e   : > { %v2107_v24 = vsel %vm2106_vm9, %v2399_v52, %v2103_v10  ;;  %v2118_v16 = vadd.f32 %v2401_v22, %v2117_v28 }
 0x26f   : > { %v2112_v35 = vsel %vm2109_vm11, %v2111_v40, %v2107_v24 }
 0x270   : > { %2130 = vst.msk [vmem:[%s150_s13] sm:$0xff] %vm2129_vm8, %v2112_v35  ;;  %v2122_v15 = vsel %vm2121_vm13, %v2401_v22, %v2118_v16 }
 0x271   : > { %v2127_v50 = vsel %vm2124_vm14, %v2126_v4, %v2122_v15 }
 0x272   : > { %2131 = vst.msk [vmem:[%s150_s13 + $0x8] sm:$0xff] %vm2129_vm8, %v2127_v50 }
 0x273   : > { %2444 = shalt.err (!%p2441_p8)
}
 0x274   : > { %s2492_s30 = smov 128   ;;  %s2493_s23 = smov 8  }
 0x275   : > { %2340 = dma.vmem_to_hbm [thread:$0]  (%p2547_p5), %s2146_s21, 256, %s2148_s22, %s2133_s24, %s2492_s30, %s2492_s30, %s2493_s23  }
 0x276 PF: > { %p2352_p9 = scmp.ge.s32.totalorder %s2483_s12, 2  ;;  %s2162_s26 = sand.u32 1, %s2471_s9  }
 0x277   : > { %s2163_s3 = scalar_lea.sflag [#allocation3], %s2162_s26 }
 0x278   : > { %p2347_p10 = pnand %p2352_p9, %p2551_p6 }
 0x27a   : > { %p2348_p11 = pneg %p2347_p10 }
 0x27c   : > { %2466 = dma.done.wait (%p2348_p11), %s2163_s3, 256  }
 0x27d   : > { %2468 = vsyncadd (%p2348_p11), %s2163_s3, 4294967040  ;;  %p13_p12 = scmp.ge.s32.totalorder %s2534_s15, 4   ;;  %s3449_s9 = smov %s2475_s10 }
 0x27e   : > { %s3450_s10 = smov %s2479_s11  ;;  %s3451_s11 = smov %s2545_s18 }
 0x27f   : > { %s3452_s12 = smov %s2534_s15  ;;  %15 = sbr.rel (!%p13_p12) target bundleno = 4 (0x4), region = 68 }
 0x284   :  { %2169 = vsyncpa [#allocation3], 1 }
 0x285   :  { %2171 = vsyncpa [#allocation3 + $0x1], 1 }
 0x286   :  { %2172 = vsyncpa [#allocation4], 1 }
 0x287   :  { %2174 = vsyncpa [#allocation4 + $0x1], 1 }

</bundles_post_ra>
